<compile_context>
chip_gen: v6e
topology: v6e:2x2x1
jax: 0.10.0
libtpu: 0.0.40
codegen_flags: <defaults>
</compile_context>

<pallas_src>
import functools

import jax
import jax.numpy as jnp
from jax.experimental import pallas as pl
from jax.experimental.pallas import tpu as pltpu


# ----------------------------------------------------------------------------
# Pallas kernel: tiled GEMM + bias + optional ReLU (f32 accumulator scratch)
# ----------------------------------------------------------------------------
def _matmul_bias_act_kernel(x_ref, w_ref, b_ref, o_ref, acc_ref, *, apply_relu):
    k = pl.program_id(2)

    @pl.when(k == 0)
    def _():
        acc_ref[...] = jnp.zeros_like(acc_ref)

    acc_ref[...] += jnp.dot(
        x_ref[...], w_ref[...], preferred_element_type=jnp.float32
    )

    @pl.when(k == pl.num_programs(2) - 1)
    def _():
        y = acc_ref[...] + b_ref[...]          # bias in f32
        if apply_relu:
            y = jnp.maximum(y, 0.0)
        o_ref[...] = y.astype(o_ref.dtype)


def _round_up(x, m):
    return ((x + m - 1) // m) * m


def _pad2d(a, rows, cols):
    pr, pc = rows - a.shape[0], cols - a.shape[1]
    if pr == 0 and pc == 0:
        return a
    return jnp.pad(a, ((0, pr), (0, pc)))


def pallas_linear(x, w, b, *, relu, tm_max=256, tn_max=512, tk_max=512):
    """y = relu?(x @ w + b), bf16 inputs to the MXU, f32 accumulation."""
    M, K = x.shape
    K2, N = w.shape
    assert K == K2, (K, K2)

    # (8,128)-aligned padded sizes and tile sizes.
    Mp, Kp, Np = _round_up(M, 8), _round_up(K, 128), _round_up(N, 128)
    tm, tk, tn = min(tm_max, Mp), min(tk_max, Kp), min(tn_max, Np)
    Mp, Kp, Np = _round_up(Mp, tm), _round_up(Kp, tk), _round_up(Np, tn)

    xp = _pad2d(x.astype(jnp.bfloat16), Mp, Kp)
    wp = _pad2d(w.astype(jnp.bfloat16), Kp, Np)
    bp = _pad2d(b.reshape(1, N).astype(jnp.float32), 1, Np)

    grid = (Mp // tm, Np // tn, Kp // tk)

    out = pl.pallas_call(
        functools.partial(_matmul_bias_act_kernel, apply_relu=relu),
        out_shape=jax.ShapeDtypeStruct((Mp, Np), jnp.float32),
        grid=grid,
        in_specs=[
            pl.BlockSpec((tm, tk), lambda i, j, k: (i, k)),
            pl.BlockSpec((tk, tn), lambda i, j, k: (k, j)),
            pl.BlockSpec((1, tn), lambda i, j, k: (0, j)),
        ],
        out_specs=pl.BlockSpec((tm, tn), lambda i, j, k: (i, j)),
        scratch_shapes=[pltpu.VMEM((tm, tn), jnp.float32)],
        compiler_params=pltpu.CompilerParams(
            dimension_semantics=("parallel", "parallel", "arbitrary")
        ),
    )(xp, wp, bp)

    return out[:M, :N]


# ----------------------------------------------------------------------------
# NHWC conv glue: im2col whose column order matches the (KH, KW, IC) weight order
# ----------------------------------------------------------------------------
def im2col_nhwc(x, kh, kw, stride):
    N, H, W, C = x.shape
    oh = (H - kh) // stride + 1
    ow = (W - kw) // stride + 1
    cols = []
    for i in range(kh):
        for j in range(kw):
            cols.append(
                x[:, i:i + stride * oh:stride, j:j + stride * ow:stride, :]
            )  # (N, oh, ow, C)
    col = jnp.concatenate(cols, axis=-1)          # (N, oh, ow, KH*KW*C)
    return col.reshape(N * oh * ow, kh * kw * C), oh, ow


def conv2d_relu_nhwc(x_nhwc, w_kkio, b, stride, kh, kw):
    """Valid-padding conv + bias + ReLU; the GEMM runs in the Pallas kernel."""
    N = x_nhwc.shape[0]
    patches, oh, ow = im2col_nhwc(x_nhwc, kh, kw, stride)   # (N*oh*ow, KH*KW*IC)
    y = pallas_linear(patches, w_kkio, b, relu=True)        # (N*oh*ow, OC)
    return y.reshape(N, oh, ow, -1)                         # NHWC


# ----------------------------------------------------------------------------
# Parameter preparation (hoisted weight layout work: done once, not per forward)
# ----------------------------------------------------------------------------
def prepare_params(p, input_dims):
    C, H, W = input_dims
    h1, w1 = (H - 8) // 4 + 1, (W - 8) // 4 + 1
    h2, w2 = (h1 - 4) // 2 + 1, (w1 - 4) // 2 + 1
    h3, w3 = (h2 - 3) // 1 + 1, (w2 - 3) // 1 + 1

    def conv_w(w):  # (OC, IC, KH, KW) -> (KH*KW*IC, OC), matches im2col_nhwc order
        OC, IC, KH, KW = w.shape
        return jnp.transpose(w, (2, 3, 1, 0)).reshape(KH * KW * IC, OC)

    # fc1 columns are in torch NCHW flatten order (C, h3, w3); permute them to the
    # NHWC flatten order (h3, w3, C) used by our conv stack, then pre-transpose.
    c3 = p["w3"].shape[0]
    out1 = p["wfc1"].shape[0]
    wfc1 = (
        p["wfc1"].reshape(out1, c3, h3, w3)
        .transpose(0, 2, 3, 1)
        .reshape(out1, h3 * w3 * c3)
        .T
    )

    bf16 = jnp.bfloat16
    return {
        "w1": conv_w(p["w1"]).astype(bf16), "b1": p["b1"],
        "w2": conv_w(p["w2"]).astype(bf16), "b2": p["b2"],
        "w3": conv_w(p["w3"]).astype(bf16), "b3": p["b3"],
        "wfc1": wfc1.astype(bf16), "bfc1": p["bfc1"],
        "wfc2": p["wfc2"].T.astype(bf16), "bfc2": p["bfc2"],
    }


# ----------------------------------------------------------------------------
# DeepQNetwork forward (c1 -> c2 -> c3 -> flatten -> fc1 -> fc2)
# ----------------------------------------------------------------------------
def deep_q_network_forward(state_nchw, pp):
    x = jnp.transpose(state_nchw, (0, 2, 3, 1))                 # NCHW -> NHWC once
    x = conv2d_relu_nhwc(x, pp["w1"], pp["b1"], stride=4, kh=8, kw=8)
    x = conv2d_relu_nhwc(x, pp["w2"], pp["b2"], stride=2, kh=4, kw=4)
    x = conv2d_relu_nhwc(x, pp["w3"], pp["b3"], stride=1, kh=3, kw=3)
    N = x.shape[0]
    flat = x.reshape(N, -1)            # NHWC flatten; wfc1 columns pre-permuted
    h = pallas_linear(flat, pp["wfc1"], pp["bfc1"], relu=True)
    actions = pallas_linear(h, pp["wfc2"], pp["bfc2"], relu=False)
    return actions


def init_params(key, input_dims, n_actions):
    C, H, W = input_dims
    ks = jax.random.split(key, 10)

    def u(k, shape, fan_in):
        bound = 1.0 / jnp.sqrt(fan_in)
        return jax.random.uniform(k, shape, jnp.float32, -bound, bound)

    h1, w1 = (H - 8) // 4 + 1, (W - 8) // 4 + 1
    h2, w2 = (h1 - 4) // 2 + 1, (w1 - 4) // 2 + 1
    h3, w3 = (h2 - 3) // 1 + 1, (w2 - 3) // 1 + 1
    fc_in = 64 * h3 * w3

    return {
        "w1": u(ks[0], (32, C, 8, 8), C * 8 * 8),
        "b1": u(ks[1], (32,), C * 8 * 8),
        "w2": u(ks[2], (64, 32, 4, 4), 32 * 4 * 4),
        "b2": u(ks[3], (64,), 32 * 4 * 4),
        "w3": u(ks[4], (64, 64, 3, 3), 64 * 3 * 3),
        "b3": u(ks[5], (64,), 64 * 3 * 3),
        "wfc1": u(ks[6], (512, fc_in), fc_in),    # PyTorch Linear: (out, in)
        "bfc1": u(ks[7], (512,), fc_in),
        "wfc2": u(ks[8], (n_actions, 512), 512),
        "bfc2": u(ks[9], (n_actions,), 512),
    }


def ref_forward(x, p):
    """Pure-JAX f32 reference with PyTorch (NCHW / OIHW) semantics."""
    def conv(x, w, b, s):
        y = jax.lax.conv_general_dilated(
            x, w, (s, s), "VALID", dimension_numbers=("NCHW", "OIHW", "NCHW"))
        return jax.nn.relu(y + b[None, :, None, None])
    y = conv(x, p["w1"], p["b1"], 4)
    y = conv(y, p["w2"], p["b2"], 2)
    y = conv(y, p["w3"], p["b3"], 1)
    y = y.reshape(y.shape[0], -1)
    y = jax.nn.relu(y @ p["wfc1"].T + p["bfc1"])
    return y @ p["wfc2"].T + p["bfc2"]


if __name__ == "__main__":
    # 36x36 is the smallest spatial size that survives the 8/4 -> 4/2 -> 3/1
    # conv stack (spatial 8 -> 3 -> 1); channels=4 (stacked frames), batch=2.
    batch = 2
    input_dims = (4, 36, 36)
    n_actions = 6

    key = jax.random.PRNGKey(0)
    k_params, k_state = jax.random.split(key)
    torch_params = init_params(k_params, input_dims, n_actions)
    prepared = prepare_params(torch_params, input_dims)
    state = jax.random.normal(k_state, (batch,) + input_dims, jnp.float32)

    fwd = jax.jit(deep_q_network_forward)
    actions = jax.block_until_ready(fwd(state, prepared))
    assert actions.shape == (batch, n_actions), actions.shape
    assert actions.dtype == jnp.float32

    # Sanity check against the f32 PyTorch-semantics reference (tolerance loosened
    # for bf16 MXU inputs with f32 accumulation).
    ref = ref_forward(state, torch_params)
    max_err = float(jnp.max(jnp.abs(actions - ref)))
    assert jnp.allclose(actions, ref, atol=5e-2, rtol=5e-2), max_err

    print("KERNEL_OK")
</pallas_src>

<mosaic_0001>
module attributes {stable_mosaic.version = 11 : i64} {
  func.func @_matmul_bias_act_kernel(%arg0: i32, %arg1: i32, %arg2: i32, %arg3: memref<128x256xbf16, #tpu.memory_space<vmem>>, %arg4: memref<256x128xbf16, #tpu.memory_space<vmem>>, %arg5: memref<1x128xf32, #tpu.memory_space<vmem>>, %arg6: memref<128x128xf32, #tpu.memory_space<vmem>>, %arg7: memref<128x128xf32, #tpu.memory_space<vmem>>) attributes {dimension_semantics = [#tpu.dimension_semantics<parallel>, #tpu.dimension_semantics<parallel>, #tpu.dimension_semantics<arbitrary>], iteration_bounds = array<i64: 1, 1, 1>, scalar_prefetch = 0 : i64, scratch_operands = 1 : i64, tpu.core_type = #tpu.core_type<tc>, window_params = [{transform_indices = @transform_0, window_bounds = array<i64: 128, 256>}, {transform_indices = @transform_1, window_bounds = array<i64: 256, 128>}, {transform_indices = @transform_2, window_bounds = array<i64: 1, 128>}, {transform_indices = @transform_3, window_bounds = array<i64: 128, 128>}]} {
    %c0_i32 = arith.constant 0 : i32
    %0 = arith.cmpi eq, %arg2, %c0_i32 : i32
    %1 = arith.extui %0 : i1 to i32
    %c0_i32_0 = arith.constant 0 : i32
    %2 = arith.cmpi ne, %1, %c0_i32_0 : i32
    scf.if %2 {
      %cst_10 = arith.constant 0.000000e+00 : f32
      %12 = vector.broadcast %cst_10 : f32 to vector<128x128xf32>
      %c0_11 = arith.constant 0 : index
      %c0_12 = arith.constant 0 : index
      %13 = vector.load %arg7[%c0_11, %c0_12] : memref<128x128xf32, #tpu.memory_space<vmem>>, vector<128x128xf32>
      tpu.vector_store %arg7[%c0_11, %c0_12], %12 {strides = array<i32>} : memref<128x128xf32, #tpu.memory_space<vmem>>, vector<128x128xf32>,
    } else {
    }
    %c0 = arith.constant 0 : index
    %c0_1 = arith.constant 0 : index
    %3 = vector.load %arg7[%c0, %c0_1] : memref<128x128xf32, #tpu.memory_space<vmem>>, vector<128x128xf32>
    %c0_2 = arith.constant 0 : index
    %c0_3 = arith.constant 0 : index
    %4 = vector.load %arg3[%c0_2, %c0_3] : memref<128x256xbf16, #tpu.memory_space<vmem>>, vector<128x256xbf16>
    %c0_4 = arith.constant 0 : index
    %c0_5 = arith.constant 0 : index
    %5 = vector.load %arg4[%c0_4, %c0_5] : memref<256x128xbf16, #tpu.memory_space<vmem>>, vector<256x128xbf16>
    %cst = arith.constant dense<0.000000e+00> : vector<128x128xf32>
    %6 = tpu.matmul %4, %5, %cst {dimension_numbers = #tpu.dot_dimension_numbers<[1], [0], [0], [1], [0, 0, 1, 1], [], []>} : vector<128x256xbf16>, vector<256x128xbf16>, vector<128x128xf32> -> vector<128x128xf32>
    %7 = arith.addf %3, %6 : vector<128x128xf32>
    %c0_6 = arith.constant 0 : index
    %c0_7 = arith.constant 0 : index
    %8 = vector.load %arg7[%c0_6, %c0_7] : memref<128x128xf32, #tpu.memory_space<vmem>>, vector<128x128xf32>
    tpu.vector_store %arg7[%c0_6, %c0_7], %7 {strides = array<i32>} : memref<128x128xf32, #tpu.memory_space<vmem>>, vector<128x128xf32>,
    %c0_i32_8 = arith.constant 0 : i32
    %9 = arith.cmpi eq, %arg2, %c0_i32_8 : i32
    %10 = arith.extui %9 : i1 to i32
    %c0_i32_9 = arith.constant 0 : i32
    %11 = arith.cmpi ne, %10, %c0_i32_9 : i32
    scf.if %11 {
      %c0_10 = arith.constant 0 : index
      %c0_11 = arith.constant 0 : index
      %12 = vector.load %arg7[%c0_10, %c0_11] : memref<128x128xf32, #tpu.memory_space<vmem>>, vector<128x128xf32>
      %c0_12 = arith.constant 0 : index
      %c0_13 = arith.constant 0 : index
      %13 = vector.load %arg5[%c0_12, %c0_13] : memref<1x128xf32, #tpu.memory_space<vmem>>, vector<1x128xf32>
      %14 = vector.broadcast %13 : vector<1x128xf32> to vector<128x128xf32>
      %15 = arith.addf %12, %14 : vector<128x128xf32>
      %cst_14 = arith.constant 0.000000e+00 : f32
      %16 = vector.broadcast %cst_14 : f32 to vector<128x128xf32>
      %17 = arith.maximumf %15, %16 : vector<128x128xf32>
      %c0_15 = arith.constant 0 : index
      %c0_16 = arith.constant 0 : index
      %18 = vector.load %arg6[%c0_15, %c0_16] : memref<128x128xf32, #tpu.memory_space<vmem>>, vector<128x128xf32>
      tpu.vector_store %arg6[%c0_15, %c0_16], %17 {strides = array<i32>} : memref<128x128xf32, #tpu.memory_space<vmem>>, vector<128x128xf32>,
    } else {
    }
    return
  }
  func.func @transform_0(%arg0: i32, %arg1: i32, %arg2: i32) -> (i32, i32) {
    %c0_i32 = arith.constant 0 : i32
    return %arg0, %arg2 : i32, i32
  }
  func.func @transform_1(%arg0: i32, %arg1: i32, %arg2: i32) -> (i32, i32) {
    %c0_i32 = arith.constant 0 : i32
    return %arg2, %arg1 : i32, i32
  }
  func.func @transform_2(%arg0: i32, %arg1: i32, %arg2: i32) -> (i32, i32) {
    %c0_i32 = arith.constant 0 : i32
    %c0_i32_0 = arith.constant 0 : i32
    return %c0_i32, %arg1 : i32, i32
  }
  func.func @transform_3(%arg0: i32, %arg1: i32, %arg2: i32) -> (i32, i32) {
    %c0_i32 = arith.constant 0 : i32
    return %arg0, %arg1 : i32, i32
  }
}

module attributes {stable_mosaic.version = 11 : i64} {
  func.func @_matmul_bias_act_kernel(%arg0: i32, %arg1: i32, %arg2: i32, %arg3: memref<24x512xbf16, #tpu.memory_space<vmem>>, %arg4: memref<512x128xbf16, #tpu.memory_space<vmem>>, %arg5: memref<1x128xf32, #tpu.memory_space<vmem>>, %arg6: memref<24x128xf32, #tpu.memory_space<vmem>>, %arg7: memref<24x128xf32, #tpu.memory_space<vmem>>) attributes {dimension_semantics = [#tpu.dimension_semantics<parallel>, #tpu.dimension_semantics<parallel>, #tpu.dimension_semantics<arbitrary>], iteration_bounds = array<i64: 1, 1, 1>, scalar_prefetch = 0 : i64, scratch_operands = 1 : i64, tpu.core_type = #tpu.core_type<tc>, window_params = [{transform_indices = @transform_0, window_bounds = array<i64: 24, 512>}, {transform_indices = @transform_1, window_bounds = array<i64: 512, 128>}, {transform_indices = @transform_2, window_bounds = array<i64: 1, 128>}, {transform_indices = @transform_3, window_bounds = array<i64: 24, 128>}]} {
    %c0_i32 = arith.constant 0 : i32
    %0 = arith.cmpi eq, %arg2, %c0_i32 : i32
    %1 = arith.extui %0 : i1 to i32
    %c0_i32_0 = arith.constant 0 : i32
    %2 = arith.cmpi ne, %1, %c0_i32_0 : i32
    scf.if %2 {
      %cst_10 = arith.constant 0.000000e+00 : f32
      %12 = vector.broadcast %cst_10 : f32 to vector<24x128xf32>
      %c0_11 = arith.constant 0 : index
      %c0_12 = arith.constant 0 : index
      %13 = vector.load %arg7[%c0_11, %c0_12] : memref<24x128xf32, #tpu.memory_space<vmem>>, vector<24x128xf32>
      tpu.vector_store %arg7[%c0_11, %c0_12], %12 {strides = array<i32>} : memref<24x128xf32, #tpu.memory_space<vmem>>, vector<24x128xf32>,
    } else {
    }
    %c0 = arith.constant 0 : index
    %c0_1 = arith.constant 0 : index
    %3 = vector.load %arg7[%c0, %c0_1] : memref<24x128xf32, #tpu.memory_space<vmem>>, vector<24x128xf32>
    %c0_2 = arith.constant 0 : index
    %c0_3 = arith.constant 0 : index
    %4 = vector.load %arg3[%c0_2, %c0_3] : memref<24x512xbf16, #tpu.memory_space<vmem>>, vector<24x512xbf16>
    %c0_4 = arith.constant 0 : index
    %c0_5 = arith.constant 0 : index
    %5 = vector.load %arg4[%c0_4, %c0_5] : memref<512x128xbf16, #tpu.memory_space<vmem>>, vector<512x128xbf16>
    %cst = arith.constant dense<0.000000e+00> : vector<24x128xf32>
    %6 = tpu.matmul %4, %5, %cst {dimension_numbers = #tpu.dot_dimension_numbers<[1], [0], [0], [1], [0, 0, 1, 1], [], []>} : vector<24x512xbf16>, vector<512x128xbf16>, vector<24x128xf32> -> vector<24x128xf32>
    %7 = arith.addf %3, %6 : vector<24x128xf32>
    %c0_6 = arith.constant 0 : index
    %c0_7 = arith.constant 0 : index
    %8 = vector.load %arg7[%c0_6, %c0_7] : memref<24x128xf32, #tpu.memory_space<vmem>>, vector<24x128xf32>
    tpu.vector_store %arg7[%c0_6, %c0_7], %7 {strides = array<i32>} : memref<24x128xf32, #tpu.memory_space<vmem>>, vector<24x128xf32>,
    %c0_i32_8 = arith.constant 0 : i32
    %9 = arith.cmpi eq, %arg2, %c0_i32_8 : i32
    %10 = arith.extui %9 : i1 to i32
    %c0_i32_9 = arith.constant 0 : i32
    %11 = arith.cmpi ne, %10, %c0_i32_9 : i32
    scf.if %11 {
      %c0_10 = arith.constant 0 : index
      %c0_11 = arith.constant 0 : index
      %12 = vector.load %arg7[%c0_10, %c0_11] : memref<24x128xf32, #tpu.memory_space<vmem>>, vector<24x128xf32>
      %c0_12 = arith.constant 0 : index
      %c0_13 = arith.constant 0 : index
      %13 = vector.load %arg5[%c0_12, %c0_13] : memref<1x128xf32, #tpu.memory_space<vmem>>, vector<1x128xf32>
      %14 = vector.broadcast %13 : vector<1x128xf32> to vector<24x128xf32>
      %15 = arith.addf %12, %14 : vector<24x128xf32>
      %cst_14 = arith.constant 0.000000e+00 : f32
      %16 = vector.broadcast %cst_14 : f32 to vector<24x128xf32>
      %17 = arith.maximumf %15, %16 : vector<24x128xf32>
      %c0_15 = arith.constant 0 : index
      %c0_16 = arith.constant 0 : index
      %18 = vector.load %arg6[%c0_15, %c0_16] : memref<24x128xf32, #tpu.memory_space<vmem>>, vector<24x128xf32>
      tpu.vector_store %arg6[%c0_15, %c0_16], %17 {strides = array<i32>} : memref<24x128xf32, #tpu.memory_space<vmem>>, vector<24x128xf32>,
    } else {
    }
    return
  }
  func.func @transform_0(%arg0: i32, %arg1: i32, %arg2: i32) -> (i32, i32) {
    %c0_i32 = arith.constant 0 : i32
    return %arg0, %arg2 : i32, i32
  }
  func.func @transform_1(%arg0: i32, %arg1: i32, %arg2: i32) -> (i32, i32) {
    %c0_i32 = arith.constant 0 : i32
    return %arg2, %arg1 : i32, i32
  }
  func.func @transform_2(%arg0: i32, %arg1: i32, %arg2: i32) -> (i32, i32) {
    %c0_i32 = arith.constant 0 : i32
    %c0_i32_0 = arith.constant 0 : i32
    return %c0_i32, %arg1 : i32, i32
  }
  func.func @transform_3(%arg0: i32, %arg1: i32, %arg2: i32) -> (i32, i32) {
    %c0_i32 = arith.constant 0 : i32
    return %arg0, %arg1 : i32, i32
  }
}

module attributes {stable_mosaic.version = 11 : i64} {
  func.func @_matmul_bias_act_kernel(%arg0: i32, %arg1: i32, %arg2: i32, %arg3: memref<8x512xbf16, #tpu.memory_space<vmem>>, %arg4: memref<512x128xbf16, #tpu.memory_space<vmem>>, %arg5: memref<1x128xf32, #tpu.memory_space<vmem>>, %arg6: memref<8x128xf32, #tpu.memory_space<vmem>>, %arg7: memref<8x128xf32, #tpu.memory_space<vmem>>) attributes {dimension_semantics = [#tpu.dimension_semantics<parallel>, #tpu.dimension_semantics<parallel>, #tpu.dimension_semantics<arbitrary>], iteration_bounds = array<i64: 1, 1, 2>, scalar_prefetch = 0 : i64, scratch_operands = 1 : i64, tpu.core_type = #tpu.core_type<tc>, window_params = [{transform_indices = @transform_0, window_bounds = array<i64: 8, 512>}, {transform_indices = @transform_1, window_bounds = array<i64: 512, 128>}, {transform_indices = @transform_2, window_bounds = array<i64: 1, 128>}, {transform_indices = @transform_3, window_bounds = array<i64: 8, 128>}]} {
    %c0_i32 = arith.constant 0 : i32
    %0 = arith.cmpi eq, %arg2, %c0_i32 : i32
    %1 = arith.extui %0 : i1 to i32
    %c0_i32_0 = arith.constant 0 : i32
    %2 = arith.cmpi ne, %1, %c0_i32_0 : i32
    scf.if %2 {
      %cst_9 = arith.constant 0.000000e+00 : f32
      %12 = vector.broadcast %cst_9 : f32 to vector<8x128xf32>
      %c0_10 = arith.constant 0 : index
      %c0_11 = arith.constant 0 : index
      %13 = vector.load %arg7[%c0_10, %c0_11] : memref<8x128xf32, #tpu.memory_space<vmem>>, vector<8x128xf32>
      tpu.vector_store %arg7[%c0_10, %c0_11], %12 {strides = array<i32>} : memref<8x128xf32, #tpu.memory_space<vmem>>, vector<8x128xf32>,
    } else {
    }
    %c0 = arith.constant 0 : index
    %c0_1 = arith.constant 0 : index
    %3 = vector.load %arg7[%c0, %c0_1] : memref<8x128xf32, #tpu.memory_space<vmem>>, vector<8x128xf32>
    %c0_2 = arith.constant 0 : index
    %c0_3 = arith.constant 0 : index
    %4 = vector.load %arg3[%c0_2, %c0_3] : memref<8x512xbf16, #tpu.memory_space<vmem>>, vector<8x512xbf16>
    %c0_4 = arith.constant 0 : index
    %c0_5 = arith.constant 0 : index
    %5 = vector.load %arg4[%c0_4, %c0_5] : memref<512x128xbf16, #tpu.memory_space<vmem>>, vector<512x128xbf16>
    %cst = arith.constant dense<0.000000e+00> : vector<8x128xf32>
    %6 = tpu.matmul %4, %5, %cst {dimension_numbers = #tpu.dot_dimension_numbers<[1], [0], [0], [1], [0, 0, 1, 1], [], []>} : vector<8x512xbf16>, vector<512x128xbf16>, vector<8x128xf32> -> vector<8x128xf32>
    %7 = arith.addf %3, %6 : vector<8x128xf32>
    %c0_6 = arith.constant 0 : index
    %c0_7 = arith.constant 0 : index
    %8 = vector.load %arg7[%c0_6, %c0_7] : memref<8x128xf32, #tpu.memory_space<vmem>>, vector<8x128xf32>
    tpu.vector_store %arg7[%c0_6, %c0_7], %7 {strides = array<i32>} : memref<8x128xf32, #tpu.memory_space<vmem>>, vector<8x128xf32>,
    %c1_i32 = arith.constant 1 : i32
    %9 = arith.cmpi eq, %arg2, %c1_i32 : i32
    %10 = arith.extui %9 : i1 to i32
    %c0_i32_8 = arith.constant 0 : i32
    %11 = arith.cmpi ne, %10, %c0_i32_8 : i32
    scf.if %11 {
      %c0_9 = arith.constant 0 : index
      %c0_10 = arith.constant 0 : index
      %12 = vector.load %arg7[%c0_9, %c0_10] : memref<8x128xf32, #tpu.memory_space<vmem>>, vector<8x128xf32>
      %c0_11 = arith.constant 0 : index
      %c0_12 = arith.constant 0 : index
      %13 = vector.load %arg5[%c0_11, %c0_12] : memref<1x128xf32, #tpu.memory_space<vmem>>, vector<1x128xf32>
      %14 = vector.broadcast %13 : vector<1x128xf32> to vector<8x128xf32>
      %15 = arith.addf %12, %14 : vector<8x128xf32>
      %cst_13 = arith.constant 0.000000e+00 : f32
      %16 = vector.broadcast %cst_13 : f32 to vector<8x128xf32>
      %17 = arith.maximumf %15, %16 : vector<8x128xf32>
      %c0_14 = arith.constant 0 : index
      %c0_15 = arith.constant 0 : index
      %18 = vector.load %arg6[%c0_14, %c0_15] : memref<8x128xf32, #tpu.memory_space<vmem>>, vector<8x128xf32>
      tpu.vector_store %arg6[%c0_14, %c0_15], %17 {strides = array<i32>} : memref<8x128xf32, #tpu.memory_space<vmem>>, vector<8x128xf32>,
    } else {
    }
    return
  }
  func.func @transform_0(%arg0: i32, %arg1: i32, %arg2: i32) -> (i32, i32) {
    %c0_i32 = arith.constant 0 : i32
    return %arg0, %arg2 : i32, i32
  }
  func.func @transform_1(%arg0: i32, %arg1: i32, %arg2: i32) -> (i32, i32) {
    %c0_i32 = arith.constant 0 : i32
    return %arg2, %arg1 : i32, i32
  }
  func.func @transform_2(%arg0: i32, %arg1: i32, %arg2: i32) -> (i32, i32) {
    %c0_i32 = arith.constant 0 : i32
    %c0_i32_0 = arith.constant 0 : i32
    return %c0_i32, %arg1 : i32, i32
  }
  func.func @transform_3(%arg0: i32, %arg1: i32, %arg2: i32) -> (i32, i32) {
    %c0_i32 = arith.constant 0 : i32
    return %arg0, %arg1 : i32, i32
  }
}

module attributes {stable_mosaic.version = 11 : i64} {
  func.func @_matmul_bias_act_kernel(%arg0: i32, %arg1: i32, %arg2: i32, %arg3: memref<8x128xbf16, #tpu.memory_space<vmem>>, %arg4: memref<128x512xbf16, #tpu.memory_space<vmem>>, %arg5: memref<1x512xf32, #tpu.memory_space<vmem>>, %arg6: memref<8x512xf32, #tpu.memory_space<vmem>>, %arg7: memref<8x512xf32, #tpu.memory_space<vmem>>) attributes {dimension_semantics = [#tpu.dimension_semantics<parallel>, #tpu.dimension_semantics<parallel>, #tpu.dimension_semantics<arbitrary>], iteration_bounds = array<i64: 1, 1, 1>, scalar_prefetch = 0 : i64, scratch_operands = 1 : i64, tpu.core_type = #tpu.core_type<tc>, window_params = [{transform_indices = @transform_0, window_bounds = array<i64: 8, 128>}, {transform_indices = @transform_1, window_bounds = array<i64: 128, 512>}, {transform_indices = @transform_2, window_bounds = array<i64: 1, 512>}, {transform_indices = @transform_3, window_bounds = array<i64: 8, 512>}]} {
    %c0_i32 = arith.constant 0 : i32
    %0 = arith.cmpi eq, %arg2, %c0_i32 : i32
    %1 = arith.extui %0 : i1 to i32
    %c0_i32_0 = arith.constant 0 : i32
    %2 = arith.cmpi ne, %1, %c0_i32_0 : i32
    scf.if %2 {
      %cst_10 = arith.constant 0.000000e+00 : f32
      %12 = vector.broadcast %cst_10 : f32 to vector<8x512xf32>
      %c0_11 = arith.constant 0 : index
      %c0_12 = arith.constant 0 : index
      %13 = vector.load %arg7[%c0_11, %c0_12] : memref<8x512xf32, #tpu.memory_space<vmem>>, vector<8x512xf32>
      tpu.vector_store %arg7[%c0_11, %c0_12], %12 {strides = array<i32>} : memref<8x512xf32, #tpu.memory_space<vmem>>, vector<8x512xf32>,
    } else {
    }
    %c0 = arith.constant 0 : index
    %c0_1 = arith.constant 0 : index
    %3 = vector.load %arg7[%c0, %c0_1] : memref<8x512xf32, #tpu.memory_space<vmem>>, vector<8x512xf32>
    %c0_2 = arith.constant 0 : index
    %c0_3 = arith.constant 0 : index
    %4 = vector.load %arg3[%c0_2, %c0_3] : memref<8x128xbf16, #tpu.memory_space<vmem>>, vector<8x128xbf16>
    %c0_4 = arith.constant 0 : index
    %c0_5 = arith.constant 0 : index
    %5 = vector.load %arg4[%c0_4, %c0_5] : memref<128x512xbf16, #tpu.memory_space<vmem>>, vector<128x512xbf16>
    %cst = arith.constant dense<0.000000e+00> : vector<8x512xf32>
    %6 = tpu.matmul %4, %5, %cst {dimension_numbers = #tpu.dot_dimension_numbers<[1], [0], [0], [1], [0, 0, 1, 1], [], []>} : vector<8x128xbf16>, vector<128x512xbf16>, vector<8x512xf32> -> vector<8x512xf32>
    %7 = arith.addf %3, %6 : vector<8x512xf32>
    %c0_6 = arith.constant 0 : index
    %c0_7 = arith.constant 0 : index
    %8 = vector.load %arg7[%c0_6, %c0_7] : memref<8x512xf32, #tpu.memory_space<vmem>>, vector<8x512xf32>
    tpu.vector_store %arg7[%c0_6, %c0_7], %7 {strides = array<i32>} : memref<8x512xf32, #tpu.memory_space<vmem>>, vector<8x512xf32>,
    %c0_i32_8 = arith.constant 0 : i32
    %9 = arith.cmpi eq, %arg2, %c0_i32_8 : i32
    %10 = arith.extui %9 : i1 to i32
    %c0_i32_9 = arith.constant 0 : i32
    %11 = arith.cmpi ne, %10, %c0_i32_9 : i32
    scf.if %11 {
      %c0_10 = arith.constant 0 : index
      %c0_11 = arith.constant 0 : index
      %12 = vector.load %arg7[%c0_10, %c0_11] : memref<8x512xf32, #tpu.memory_space<vmem>>, vector<8x512xf32>
      %c0_12 = arith.constant 0 : index
      %c0_13 = arith.constant 0 : index
      %13 = vector.load %arg5[%c0_12, %c0_13] : memref<1x512xf32, #tpu.memory_space<vmem>>, vector<1x512xf32>
      %14 = vector.broadcast %13 : vector<1x512xf32> to vector<8x512xf32>
      %15 = arith.addf %12, %14 : vector<8x512xf32>
      %cst_14 = arith.constant 0.000000e+00 : f32
      %16 = vector.broadcast %cst_14 : f32 to vector<8x512xf32>
      %17 = arith.maximumf %15, %16 : vector<8x512xf32>
      %c0_15 = arith.constant 0 : index
      %c0_16 = arith.constant 0 : index
      %18 = vector.load %arg6[%c0_15, %c0_16] : memref<8x512xf32, #tpu.memory_space<vmem>>, vector<8x512xf32>
      tpu.vector_store %arg6[%c0_15, %c0_16], %17 {strides = array<i32>} : memref<8x512xf32, #tpu.memory_space<vmem>>, vector<8x512xf32>,
    } else {
    }
    return
  }
  func.func @transform_0(%arg0: i32, %arg1: i32, %arg2: i32) -> (i32, i32) {
    %c0_i32 = arith.constant 0 : i32
    return %arg0, %arg2 : i32, i32
  }
  func.func @transform_1(%arg0: i32, %arg1: i32, %arg2: i32) -> (i32, i32) {
    %c0_i32 = arith.constant 0 : i32
    return %arg2, %arg1 : i32, i32
  }
  func.func @transform_2(%arg0: i32, %arg1: i32, %arg2: i32) -> (i32, i32) {
    %c0_i32 = arith.constant 0 : i32
    %c0_i32_0 = arith.constant 0 : i32
    return %c0_i32, %arg1 : i32, i32
  }
  func.func @transform_3(%arg0: i32, %arg1: i32, %arg2: i32) -> (i32, i32) {
    %c0_i32 = arith.constant 0 : i32
    return %arg0, %arg1 : i32, i32
  }
}

module attributes {stable_mosaic.version = 11 : i64} {
  func.func @_matmul_bias_act_kernel(%arg0: i32, %arg1: i32, %arg2: i32, %arg3: memref<8x512xbf16, #tpu.memory_space<vmem>>, %arg4: memref<512x128xbf16, #tpu.memory_space<vmem>>, %arg5: memref<1x128xf32, #tpu.memory_space<vmem>>, %arg6: memref<8x128xf32, #tpu.memory_space<vmem>>, %arg7: memref<8x128xf32, #tpu.memory_space<vmem>>) attributes {dimension_semantics = [#tpu.dimension_semantics<parallel>, #tpu.dimension_semantics<parallel>, #tpu.dimension_semantics<arbitrary>], iteration_bounds = array<i64: 1, 1, 1>, scalar_prefetch = 0 : i64, scratch_operands = 1 : i64, tpu.core_type = #tpu.core_type<tc>, window_params = [{transform_indices = @transform_0, window_bounds = array<i64: 8, 512>}, {transform_indices = @transform_1, window_bounds = array<i64: 512, 128>}, {transform_indices = @transform_2, window_bounds = array<i64: 1, 128>}, {transform_indices = @transform_3, window_bounds = array<i64: 8, 128>}]} {
    %c0_i32 = arith.constant 0 : i32
    %0 = arith.cmpi eq, %arg2, %c0_i32 : i32
    %1 = arith.extui %0 : i1 to i32
    %c0_i32_0 = arith.constant 0 : i32
    %2 = arith.cmpi ne, %1, %c0_i32_0 : i32
    scf.if %2 {
      %cst_10 = arith.constant 0.000000e+00 : f32
      %12 = vector.broadcast %cst_10 : f32 to vector<8x128xf32>
      %c0_11 = arith.constant 0 : index
      %c0_12 = arith.constant 0 : index
      %13 = vector.load %arg7[%c0_11, %c0_12] : memref<8x128xf32, #tpu.memory_space<vmem>>, vector<8x128xf32>
      tpu.vector_store %arg7[%c0_11, %c0_12], %12 {strides = array<i32>} : memref<8x128xf32, #tpu.memory_space<vmem>>, vector<8x128xf32>,
    } else {
    }
    %c0 = arith.constant 0 : index
    %c0_1 = arith.constant 0 : index
    %3 = vector.load %arg7[%c0, %c0_1] : memref<8x128xf32, #tpu.memory_space<vmem>>, vector<8x128xf32>
    %c0_2 = arith.constant 0 : index
    %c0_3 = arith.constant 0 : index
    %4 = vector.load %arg3[%c0_2, %c0_3] : memref<8x512xbf16, #tpu.memory_space<vmem>>, vector<8x512xbf16>
    %c0_4 = arith.constant 0 : index
    %c0_5 = arith.constant 0 : index
    %5 = vector.load %arg4[%c0_4, %c0_5] : memref<512x128xbf16, #tpu.memory_space<vmem>>, vector<512x128xbf16>
    %cst = arith.constant dense<0.000000e+00> : vector<8x128xf32>
    %6 = tpu.matmul %4, %5, %cst {dimension_numbers = #tpu.dot_dimension_numbers<[1], [0], [0], [1], [0, 0, 1, 1], [], []>} : vector<8x512xbf16>, vector<512x128xbf16>, vector<8x128xf32> -> vector<8x128xf32>
    %7 = arith.addf %3, %6 : vector<8x128xf32>
    %c0_6 = arith.constant 0 : index
    %c0_7 = arith.constant 0 : index
    %8 = vector.load %arg7[%c0_6, %c0_7] : memref<8x128xf32, #tpu.memory_space<vmem>>, vector<8x128xf32>
    tpu.vector_store %arg7[%c0_6, %c0_7], %7 {strides = array<i32>} : memref<8x128xf32, #tpu.memory_space<vmem>>, vector<8x128xf32>,
    %c0_i32_8 = arith.constant 0 : i32
    %9 = arith.cmpi eq, %arg2, %c0_i32_8 : i32
    %10 = arith.extui %9 : i1 to i32
    %c0_i32_9 = arith.constant 0 : i32
    %11 = arith.cmpi ne, %10, %c0_i32_9 : i32
    scf.if %11 {
      %c0_10 = arith.constant 0 : index
      %c0_11 = arith.constant 0 : index
      %12 = vector.load %arg7[%c0_10, %c0_11] : memref<8x128xf32, #tpu.memory_space<vmem>>, vector<8x128xf32>
      %c0_12 = arith.constant 0 : index
      %c0_13 = arith.constant 0 : index
      %13 = vector.load %arg5[%c0_12, %c0_13] : memref<1x128xf32, #tpu.memory_space<vmem>>, vector<1x128xf32>
      %14 = vector.broadcast %13 : vector<1x128xf32> to vector<8x128xf32>
      %15 = arith.addf %12, %14 : vector<8x128xf32>
      %c0_14 = arith.constant 0 : index
      %c0_15 = arith.constant 0 : index
      %16 = vector.load %arg6[%c0_14, %c0_15] : memref<8x128xf32, #tpu.memory_space<vmem>>, vector<8x128xf32>
      tpu.vector_store %arg6[%c0_14, %c0_15], %15 {strides = array<i32>} : memref<8x128xf32, #tpu.memory_space<vmem>>, vector<8x128xf32>,
    } else {
    }
    return
  }
  func.func @transform_0(%arg0: i32, %arg1: i32, %arg2: i32) -> (i32, i32) {
    %c0_i32 = arith.constant 0 : i32
    return %arg0, %arg2 : i32, i32
  }
  func.func @transform_1(%arg0: i32, %arg1: i32, %arg2: i32) -> (i32, i32) {
    %c0_i32 = arith.constant 0 : i32
    return %arg2, %arg1 : i32, i32
  }
  func.func @transform_2(%arg0: i32, %arg1: i32, %arg2: i32) -> (i32, i32) {
    %c0_i32 = arith.constant 0 : i32
    %c0_i32_0 = arith.constant 0 : i32
    return %c0_i32, %arg1 : i32, i32
  }
  func.func @transform_3(%arg0: i32, %arg1: i32, %arg2: i32) -> (i32, i32) {
    %c0_i32 = arith.constant 0 : i32
    return %arg0, %arg1 : i32, i32
  }
}

</mosaic_0001>

<bundles_post_ra>
// kernel: deep_q_network_forward.5
= control target key start
LH: loop header
LB: loop body
LE: loop exit
PB: predicated region body
PF: predicated region fallthrough
CT: control target
= control target key end

     0   :  { %s820_s1 = inlined_call_operand.vmem [shape: bf16[256,128], index: 1, kind: input, shape index: {}]   ;;  %s821_s0 = inlined_call_operand.vmem [shape: bf16[128,256], index: 0, kind: input, shape index: {}]   ;;  %s822_s2 = inlined_call_operand.vmem [shape: f32[1,128], index: 2, kind: input, shape index: {}]   ;;  %s823_s3 = inlined_call_operand.vmem [shape: f32[128,128], index: 3, kind: output, shape index: {}]  }
   0x1   :  { %v595_v0 = vld [vmem:[%s820_s1 + $0x78] sm:$0xff]   ;;  %v597_v2 = vld [vmem:[%s820_s1 + $0x70] sm:$0xff]   ;;  %v599_v4 = vld [vmem:[%s820_s1 + $0x68] sm:$0xff]  }
   0x2   :  { %v596_v1 = vld [vmem:[%s820_s1 + $0x38] sm:$0xff]   ;;  %515 = vmatprep.subr.bf16.mxu0 %v595_v0  ;;  %579 = vmatprep.subr.bf16.mxu1 %v595_v0  ;;  %v598_v3 = vld [vmem:[%s820_s1 + $0x30] sm:$0xff]   ;;  %v600_v5 = vld [vmem:[%s820_s1 + $0x28] sm:$0xff]  }
   0x3   :  { %516 = vmatpush3.bf16.msra.mxu0 %v596_v1  ;;  %587 = vmatpush3.bf16.msra.mxu1 %v596_v1  ;;  %v601_v6 = vld [vmem:[%s820_s1 + $0x60] sm:$0xff]   ;;  %v603_v8 = vld [vmem:[%s820_s1 + $0x58] sm:$0xff]   ;;  %v605_v10 = vld [vmem:[%s820_s1 + $0x50] sm:$0xff]  }
   0x4   :  { %517 = vmatprep.subr.bf16.mxu0 %v597_v2  ;;  %580 = vmatprep.subr.bf16.mxu1 %v597_v2  ;;  %v602_v7 = vld [vmem:[%s820_s1 + $0x20] sm:$0xff]   ;;  %v604_v9 = vld [vmem:[%s820_s1 + $0x18] sm:$0xff]   ;;  %v606_v13 = vld [vmem:[%s820_s1 + $0x10] sm:$0xff]  }
   0x5   :  { %v613_v11 = vld [vmem:[%s821_s0 + $0x4] ss:$8 sps:$4 sm:$0xff]   ;;  %v611_v18 = vld [vmem:[%s821_s0] ss:$8 sps:$4 sm:$0xff]   ;;  %v617_v20 = vld [vmem:[%s821_s0 + $0x14] ss:$8 sps:$4 sm:$0xff]  }
   0x6   :  { %v616_v12 = vld [vmem:[%s821_s0 + $0x44] ss:$8 sps:$4 sm:$0xff]   ;;  %307 = vmatprep.mubr.bf16.mxu0 %v613_v11  ;;  %v614_v19 = vld [vmem:[%s821_s0 + $0x40] ss:$8 sps:$4 sm:$0xff]   ;;  %v619_v21 = vld [vmem:[%s821_s0 + $0x54] ss:$8 sps:$4 sm:$0xff]  }
   0x7   :  { %518 = vmatpush3.bf16.msra.mxu0 %v598_v3  ;;  %588 = vmatpush3.bf16.msra.mxu1 %v598_v3  ;;  %v607_v14 = vld [vmem:[%s820_s1 + $0x48] sm:$0xff]   ;;  %v609_v16 = vld [vmem:[%s820_s1 + $0x40] sm:$0xff]   ;;  %v621_v22 = vld [vmem:[%s821_s0 + $0x10] ss:$8 sps:$4 sm:$0xff]  }
   0x8   :  { %519 = vmatprep.subr.bf16.mxu0 %v599_v4  ;;  %581 = vmatprep.subr.bf16.mxu1 %v599_v4  ;;  %v608_v15 = vld [vmem:[%s820_s1 + $0x8] sm:$0xff]   ;;  %v610_v17 = vld [vmem:[%s820_s1] sm:$0xff]   ;;  %v622_v23 = vld [vmem:[%s821_s0 + $0x50] ss:$8 sps:$4 sm:$0xff]  }
   0x9   :  { %339 = vmatprep.mubr.bf16.mxu1 %v616_v12  ;;  %v623_v24 = vld [vmem:[%s821_s0 + $0x24] ss:$8 sps:$4 sm:$0xff]   ;;  %v627_v26 = vld [vmem:[%s821_s0 + $0x20] ss:$8 sps:$4 sm:$0xff]   ;;  %v629_v28 = vld [vmem:[%s821_s0 + $0x34] ss:$8 sps:$4 sm:$0xff]  }
   0xa   :  { %v625_v25 = vld [vmem:[%s821_s0 + $0x64] ss:$8 sps:$4 sm:$0xff]   ;;  %v628_v27 = vld [vmem:[%s821_s0 + $0x60] ss:$8 sps:$4 sm:$0xff]   ;;  %v631_v29 = vld [vmem:[%s821_s0 + $0x74] ss:$8 sps:$4 sm:$0xff]  }
   0xb   :  { %520 = vmatpush3.bf16.msra.mxu0 %v600_v5  ;;  %589 = vmatpush3.bf16.msra.mxu1 %v600_v5  ;;  %v633_v30 = vld [vmem:[%s821_s0 + $0x30] ss:$8 sps:$4 sm:$0xff]   ;;  %v754_v35 = vld [vmem:[%s822_s2] ss:$0 sm:$0xff] }
   0xc   :  { %521 = vmatprep.subr.bf16.mxu0 %v601_v6  ;;  %582 = vmatprep.subr.bf16.mxu1 %v601_v6  ;;  %v634_v31 = vld [vmem:[%s821_s0 + $0x70] ss:$8 sps:$4 sm:$0xff]  }
   0xf   :  { %522 = vmatpush3.bf16.msra.mxu0 %v602_v7  ;;  %590 = vmatpush3.bf16.msra.mxu1 %v602_v7 }
  0x10   :  { %523 = vmatprep.subr.bf16.mxu0 %v603_v8  ;;  %583 = vmatprep.subr.bf16.mxu1 %v603_v8 }
  0x13   :  { %524 = vmatpush3.bf16.msra.mxu0 %v604_v9  ;;  %591 = vmatpush3.bf16.msra.mxu1 %v604_v9 }
  0x14   :  { %525 = vmatprep.subr.bf16.mxu0 %v605_v10  ;;  %584 = vmatprep.subr.bf16.mxu1 %v605_v10 }
  0x17   :  { %526 = vmatpush3.bf16.msra.mxu0 %v606_v13  ;;  %592 = vmatpush3.bf16.msra.mxu1 %v606_v13 }
  0x18   :  { %527 = vmatprep.subr.bf16.mxu0 %v607_v14  ;;  %585 = vmatprep.subr.bf16.mxu1 %v607_v14 }
  0x1b   :  { %528 = vmatpush3.bf16.msra.mxu0 %v608_v15  ;;  %593 = vmatpush3.bf16.msra.mxu1 %v608_v15 }
  0x1c   :  { %529 = vmatprep.subr.bf16.mxu0 %v609_v16  ;;  %586 = vmatprep.subr.bf16.mxu1 %v609_v16 }
  0x1f   :  { %530 = vmatpush3.bf16.msra.mxu0 %v610_v17  ;;  %594 = vmatpush3.bf16.msra.mxu1 %v610_v17 }
  0x22   :  { %308 = vmatmul.mubr.bf16.vlgmr.msra.gmra.mxu0 %v611_v18  ;;  %340 = vmatmul.mubr.bf16.vlgmr.msra.gmra.mxu1 %v614_v19 }
  0x23   :  { %315 = vmatprep.mubr.bf16.mxu0 %v617_v20  ;;  %347 = vmatprep.mubr.bf16.mxu1 %v619_v21 }
  0x2a   :  { %316 = vmatmul.mubr.bf16.gmra.mxu0 %v621_v22  ;;  %348 = vmatmul.mubr.bf16.gmra.mxu1 %v622_v23 }
  0x2b   :  { %323 = vmatprep.mubr.bf16.mxu0 %v623_v24  ;;  %355 = vmatprep.mubr.bf16.mxu1 %v625_v25 }
  0x32   :  { %324 = vmatmul.mubr.bf16.gmra.mxu0 %v627_v26  ;;  %356 = vmatmul.mubr.bf16.gmra.mxu1 %v628_v27 }
  0x33   :  { %331 = vmatprep.mubr.bf16.mxu0 %v629_v28  ;;  %363 = vmatprep.mubr.bf16.mxu1 %v631_v29 }
  0x3a   :  { %332 = vmatmul.mubr.bf16.gmra.mxu0 %v633_v30  ;;  %364 = vmatmul.mubr.bf16.gmra.mxu1 %v634_v31 }
  0xe2   :  { %v531_v32 = vpop.f32.mrf.mxu0  ;;  %v555_v33 = vpop.f32.mrf.mxu1 }
  0xe4   :  { %v532_v34 = vpop.f32.mrf.mxu0  ;;  %v556_v36 = vpop.f32.mrf.mxu1 }
  0xe5   :  { %v533_v37 = vadd.f32 %v532_v34, %v531_v32  ;;  %v557_v38 = vadd.f32 %v556_v36, %v555_v33 }
  0xe6   :  { %v534_v39 = vpop.f32.mrf.mxu0  ;;  %v558_v40 = vpop.f32.mrf.mxu1 }
  0xe7   :  { %v430_v41 = vadd.f32 %v533_v37, %v754_v35  ;;  %v438_v42 = vadd.f32 %v557_v38, %v754_v35 }
  0xe8   :  { %v535_v43 = vpop.f32.mrf.mxu0  ;;  %v559_v44 = vpop.f32.mrf.mxu1 }
  0xe9   :  { %v446_v45 = vmax.f32 %v430_v41, 0.0  ;;  %v454_v46 = vmax.f32 %v438_v42, 0.0  ;;  %v536_v47 = vadd.f32 %v535_v43, %v534_v39  ;;  %v560_v48 = vadd.f32 %v559_v44, %v558_v40 }
  0xea   :  { %v537_v49 = vpop.f32.mrf.mxu0  ;;  %v561_v50 = vpop.f32.mrf.mxu1 }
  0xeb   :  { %462 = vst [vmem:[%s823_s3] sm:$0xff] %v446_v45  ;;  %470 = vst [vmem:[%s823_s3 + $0x40] sm:$0xff] %v454_v46  ;;  %v431_v51 = vadd.f32 %v536_v47, %v754_v35  ;;  %v439_v52 = vadd.f32 %v560_v48, %v754_v35 }
  0xec   :  { %v538_v53 = vpop.f32.mrf.mxu0  ;;  %v562_v54 = vpop.f32.mrf.mxu1 }
  0xed   :  { %v447_v55 = vmax.f32 %v431_v51, 0.0  ;;  %v455_v56 = vmax.f32 %v439_v52, 0.0  ;;  %v539_v57 = vadd.f32 %v538_v53, %v537_v49  ;;  %v563_v58 = vadd.f32 %v562_v54, %v561_v50 }
  0xee   :  { %v540_v59 = vpop.f32.mrf.mxu0  ;;  %v564_v60 = vpop.f32.mrf.mxu1 }
  0xef   :  { %463 = vst [vmem:[%s823_s3 + $0x8] sm:$0xff] %v447_v55  ;;  %471 = vst [vmem:[%s823_s3 + $0x48] sm:$0xff] %v455_v56  ;;  %v432_v61 = vadd.f32 %v539_v57, %v754_v35  ;;  %v440_v62 = vadd.f32 %v563_v58, %v754_v35 }
  0xf0   :  { %v541_v63 = vpop.f32.mrf.mxu0  ;;  %v565_v0 = vpop.f32.mrf.mxu1 }
  0xf1   :  { %v448_v1 = vmax.f32 %v432_v61, 0.0  ;;  %v456_v2 = vmax.f32 %v440_v62, 0.0  ;;  %v542_v3 = vadd.f32 %v541_v63, %v540_v59  ;;  %v566_v4 = vadd.f32 %v565_v0, %v564_v60 }
  0xf2   :  { %v543_v5 = vpop.f32.mrf.mxu0  ;;  %v567_v6 = vpop.f32.mrf.mxu1 }
  0xf3   :  { %464 = vst [vmem:[%s823_s3 + $0x10] sm:$0xff] %v448_v1  ;;  %472 = vst [vmem:[%s823_s3 + $0x50] sm:$0xff] %v456_v2  ;;  %v433_v7 = vadd.f32 %v542_v3, %v754_v35  ;;  %v441_v8 = vadd.f32 %v566_v4, %v754_v35 }
  0xf4   :  { %v544_v9 = vpop.f32.mrf.mxu0  ;;  %v568_v10 = vpop.f32.mrf.mxu1 }
  0xf5   :  { %v449_v11 = vmax.f32 %v433_v7, 0.0  ;;  %v457_v12 = vmax.f32 %v441_v8, 0.0  ;;  %v545_v13 = vadd.f32 %v544_v9, %v543_v5  ;;  %v569_v14 = vadd.f32 %v568_v10, %v567_v6 }
  0xf6   :  { %v546_v15 = vpop.f32.mrf.mxu0  ;;  %v570_v16 = vpop.f32.mrf.mxu1 }
  0xf7   :  { %465 = vst [vmem:[%s823_s3 + $0x18] sm:$0xff] %v449_v11  ;;  %473 = vst [vmem:[%s823_s3 + $0x58] sm:$0xff] %v457_v12  ;;  %v434_v17 = vadd.f32 %v545_v13, %v754_v35  ;;  %v442_v18 = vadd.f32 %v569_v14, %v754_v35 }
  0xf8   :  { %v547_v19 = vpop.f32.mrf.mxu0  ;;  %v571_v20 = vpop.f32.mrf.mxu1 }
  0xf9   :  { %v450_v21 = vmax.f32 %v434_v17, 0.0  ;;  %v458_v22 = vmax.f32 %v442_v18, 0.0  ;;  %v548_v23 = vadd.f32 %v547_v19, %v546_v15  ;;  %v572_v24 = vadd.f32 %v571_v20, %v570_v16 }
  0xfa   :  { %v549_v25 = vpop.f32.mrf.mxu0  ;;  %v573_v26 = vpop.f32.mrf.mxu1 }
  0xfb   :  { %466 = vst [vmem:[%s823_s3 + $0x20] sm:$0xff] %v450_v21  ;;  %474 = vst [vmem:[%s823_s3 + $0x60] sm:$0xff] %v458_v22  ;;  %v435_v27 = vadd.f32 %v548_v23, %v754_v35  ;;  %v443_v28 = vadd.f32 %v572_v24, %v754_v35 }
  0xfc   :  { %v550_v29 = vpop.f32.mrf.mxu0  ;;  %v574_v30 = vpop.f32.mrf.mxu1 }
  0xfd   :  { %v451_v31 = vmax.f32 %v435_v27, 0.0  ;;  %v459_v32 = vmax.f32 %v443_v28, 0.0  ;;  %v551_v33 = vadd.f32 %v550_v29, %v549_v25  ;;  %v575_v34 = vadd.f32 %v574_v30, %v573_v26 }
  0xfe   :  { %v552_v36 = vpop.f32.mrf.mxu0  ;;  %v576_v37 = vpop.f32.mrf.mxu1 }
  0xff   :  { %467 = vst [vmem:[%s823_s3 + $0x28] sm:$0xff] %v451_v31  ;;  %475 = vst [vmem:[%s823_s3 + $0x68] sm:$0xff] %v459_v32  ;;  %v436_v38 = vadd.f32 %v551_v33, %v754_v35  ;;  %v444_v39 = vadd.f32 %v575_v34, %v754_v35 }
 0x100   :  { %v553_v40 = vpop.f32.mrf.mxu0  ;;  %v577_v41 = vpop.f32.mrf.mxu1 }
 0x101   :  { %v452_v42 = vmax.f32 %v436_v38, 0.0  ;;  %v460_v43 = vmax.f32 %v444_v39, 0.0  ;;  %v554_v44 = vadd.f32 %v553_v40, %v552_v36  ;;  %v578_v45 = vadd.f32 %v577_v41, %v576_v37 }
 0x103   :  { %468 = vst [vmem:[%s823_s3 + $0x30] sm:$0xff] %v452_v42  ;;  %476 = vst [vmem:[%s823_s3 + $0x70] sm:$0xff] %v460_v43  ;;  %v437_v46 = vadd.f32 %v554_v44, %v754_v35  ;;  %v445_v47 = vadd.f32 %v578_v45, %v754_v35 }
 0x105   :  { %v453_v48 = vmax.f32 %v437_v46, 0.0  ;;  %v461_v49 = vmax.f32 %v445_v47, 0.0 }
 0x107   :  { %469 = vst [vmem:[%s823_s3 + $0x38] sm:$0xff] %v453_v48  ;;  %477 = vst [vmem:[%s823_s3 + $0x78] sm:$0xff] %v461_v49 }

// kernel: deep_q_network_forward.6
= control target key start
LH: loop header
LB: loop body
LE: loop exit
PB: predicated region body
PF: predicated region fallthrough
CT: control target
= control target key end

     0   :  { %s734_s1 = inlined_call_operand.vmem [shape: bf16[512,128], index: 1, kind: input, shape index: {}]   ;;  %s735_s0 = inlined_call_operand.vmem [shape: bf16[24,512], index: 0, kind: input, shape index: {}]   ;;  %s736_s2 = inlined_call_operand.vmem [shape: f32[1,128], index: 2, kind: input, shape index: {}]   ;;  %s737_s3 = inlined_call_operand.vmem [shape: f32[24,128], index: 3, kind: output, shape index: {}]  }
   0x1   :  { %v546_v0 = vld [vmem:[%s734_s1 + $0x78] sm:$0xff]   ;;  %v550_v4 = vld [vmem:[%s734_s1 + $0x70] sm:$0xff]   ;;  %v554_v8 = vld [vmem:[%s734_s1 + $0x68] sm:$0xff]  }
   0x2   :  { %v547_v1 = vld [vmem:[%s734_s1 + $0xf8] sm:$0xff]   ;;  %490 = vmatprep.subr.bf16.mxu0 %v546_v0  ;;  %v551_v5 = vld [vmem:[%s734_s1 + $0xf0] sm:$0xff]   ;;  %v555_v9 = vld [vmem:[%s734_s1 + $0xe8] sm:$0xff]  }
   0x3   :  { %v548_v2 = vld [vmem:[%s734_s1 + $0x38] sm:$0xff]   ;;  %518 = vmatprep.subr.bf16.mxu1 %v547_v1  ;;  %v552_v6 = vld [vmem:[%s734_s1 + $0x30] sm:$0xff]   ;;  %v556_v10 = vld [vmem:[%s734_s1 + $0x28] sm:$0xff]  }
   0x4   :  { %v549_v3 = vld [vmem:[%s734_s1 + $0xb8] sm:$0xff]   ;;  %491 = vmatpush3.bf16.msra.mxu0 %v548_v2  ;;  %v553_v7 = vld [vmem:[%s734_s1 + $0xb0] sm:$0xff]   ;;  %v557_v11 = vld [vmem:[%s734_s1 + $0xa8] sm:$0xff]  }
   0x5   :  { %519 = vmatpush3.bf16.msra.mxu1 %v549_v3  ;;  %492 = vmatprep.subr.bf16.mxu0 %v550_v4  ;;  %v558_v12 = vld [vmem:[%s734_s1 + $0x60] sm:$0xff]   ;;  %v562_v16 = vld [vmem:[%s734_s1 + $0x58] sm:$0xff]   ;;  %v566_v20 = vld [vmem:[%s734_s1 + $0x50] sm:$0xff]  }
   0x6   :  { %520 = vmatprep.subr.bf16.mxu1 %v551_v5  ;;  %v559_v13 = vld [vmem:[%s734_s1 + $0xe0] sm:$0xff]   ;;  %v563_v17 = vld [vmem:[%s734_s1 + $0xd8] sm:$0xff]   ;;  %v567_v21 = vld [vmem:[%s734_s1 + $0xd0] sm:$0xff]  }
   0x7   :  { %v560_v14 = vld [vmem:[%s734_s1 + $0x20] sm:$0xff]   ;;  %v564_v18 = vld [vmem:[%s734_s1 + $0x18] sm:$0xff]   ;;  %v568_v22 = vld [vmem:[%s734_s1 + $0x10] sm:$0xff]  }
   0x8   :  { %493 = vmatpush3.bf16.msra.mxu0 %v552_v6  ;;  %v561_v15 = vld [vmem:[%s734_s1 + $0xa0] sm:$0xff]   ;;  %v565_v19 = vld [vmem:[%s734_s1 + $0x98] sm:$0xff]   ;;  %v569_v23 = vld [vmem:[%s734_s1 + $0x90] sm:$0xff]  }
   0x9   :  { %521 = vmatpush3.bf16.msra.mxu1 %v553_v7  ;;  %494 = vmatprep.subr.bf16.mxu0 %v554_v8  ;;  %v570_v24 = vld [vmem:[%s734_s1 + $0x48] sm:$0xff]   ;;  %v574_v28 = vld [vmem:[%s734_s1 + $0x40] sm:$0xff]  }
   0xa   :  { %522 = vmatprep.subr.bf16.mxu1 %v555_v9  ;;  %v571_v25 = vld [vmem:[%s734_s1 + $0xc8] sm:$0xff]   ;;  %v575_v29 = vld [vmem:[%s734_s1 + $0xc0] sm:$0xff]  }
   0xb   :  { %v572_v26 = vld [vmem:[%s734_s1 + $0x8] sm:$0xff]   ;;  %v576_v30 = vld [vmem:[%s734_s1] sm:$0xff]  }
   0xc   :  { %495 = vmatpush3.bf16.msra.mxu0 %v556_v10  ;;  %v573_v27 = vld [vmem:[%s734_s1 + $0x88] sm:$0xff]   ;;  %v577_v31 = vld [vmem:[%s734_s1 + $0x80] sm:$0xff]  }
   0xd   :  { %523 = vmatpush3.bf16.msra.mxu1 %v557_v11  ;;  %496 = vmatprep.subr.bf16.mxu0 %v558_v12  ;;  %v578_v32 = vld [vmem:[%s735_s0] ss:$16 sps:$4 sm:$0xff]   ;;  %v580_v33 = vld [vmem:[%s735_s0 + $0x4] ss:$16 sps:$4 sm:$0xff]   ;;  %v581_v34 = vld [vmem:[%s735_s0 + $0x8] ss:$16 sps:$4 sm:$0xff]  }
   0xe   :  { %524 = vmatprep.subr.bf16.mxu1 %v559_v13  ;;  %v583_v35 = vld [vmem:[%s735_s0 + $0xc] ss:$16 sps:$4 sm:$0xff]   ;;  %v29_v36 = vld [vmem:[%s735_s0 + $0x20] sm:$0xff]  ;;  %353 = vmatprep.mubr.bf16.mxu0 %v580_v33 }
   0xf   :  { %v454_v37 = vcombine.high %v29_v36, %v29_v36  ;;  %v30_v38 = vld [vmem:[%s735_s0 + $0x28] sm:$0xff]  ;;  %401 = vmatprep.mubr.bf16.mxu1 %v583_v35  ;;  %v453_v40 = vcombine.low %v29_v36, %v29_v36  ;;  %v489_v49 = vld [vmem:[%s736_s2] ss:$0 sm:$0xff] }
  0x10   :  { %497 = vmatpush3.bf16.msra.mxu0 %v560_v14  ;;  %v456_v39 = vcombine.high %v30_v38, %v30_v38  ;;  %v455_v41 = vcombine.low %v30_v38, %v30_v38 }
  0x11   :  { %525 = vmatpush3.bf16.msra.mxu1 %v561_v15  ;;  %498 = vmatprep.subr.bf16.mxu0 %v562_v16 }
  0x12   :  { %526 = vmatprep.subr.bf16.mxu1 %v563_v17 }
  0x14   :  { %499 = vmatpush3.bf16.msra.mxu0 %v564_v18 }
  0x15   :  { %527 = vmatpush3.bf16.msra.mxu1 %v565_v19  ;;  %500 = vmatprep.subr.bf16.mxu0 %v566_v20 }
  0x16   :  { %528 = vmatprep.subr.bf16.mxu1 %v567_v21 }
  0x18   :  { %501 = vmatpush3.bf16.msra.mxu0 %v568_v22 }
  0x19   :  { %529 = vmatpush3.bf16.msra.mxu1 %v569_v23  ;;  %502 = vmatprep.subr.bf16.mxu0 %v570_v24 }
  0x1a   :  { %530 = vmatprep.subr.bf16.mxu1 %v571_v25 }
  0x1c   :  { %503 = vmatpush3.bf16.msra.mxu0 %v572_v26 }
  0x1d   :  { %531 = vmatpush3.bf16.msra.mxu1 %v573_v27  ;;  %504 = vmatprep.subr.bf16.mxu0 %v574_v28 }
  0x1e   :  { %532 = vmatprep.subr.bf16.mxu1 %v575_v29 }
  0x20   :  { %505 = vmatpush3.bf16.msra.mxu0 %v576_v30 }
  0x21   :  { %533 = vmatpush3.bf16.msra.mxu1 %v577_v31 }
  0x23   :  { %354 = vmatmul.mubr.bf16.vlgmr.msra.gmra.mxu0 %v578_v32 }
  0x24   :  { %402 = vmatmul.mubr.bf16.vlgmr.msra.gmra.mxu1 %v581_v34  ;;  %361 = vmatprep.mubr.bf16.mxu0 %v454_v37 }
  0x25   :  { %409 = vmatprep.mubr.bf16.mxu1 %v456_v39 }
  0x2b   :  { %362 = vmatmul.mubr.bf16.gmra.mxu0 %v453_v40 }
  0x2c   :  { %410 = vmatmul.mubr.bf16.gmra.mxu1 %v455_v41 }
  0xe3   :  { %v506_v42 = vpop.f32.mrf.mxu0 }
  0xe4   :  { %v534_v43 = vpop.f32.mrf.mxu1 }
  0xe5   :  { %v507_v44 = vpop.f32.mrf.mxu0 }
  0xe6   :  { %v508_v45 = vadd.f32 %v507_v44, %v506_v42  ;;  %v535_v46 = vpop.f32.mrf.mxu1 }
  0xe7   :  { %v536_v47 = vadd.f32 %v535_v46, %v534_v43  ;;  %v509_v48 = vpop.f32.mrf.mxu0 }
  0xe8   :  { %v537_v50 = vpop.f32.mrf.mxu1 }
  0xe9   :  { %v404_v51 = vadd.f32 %v536_v47, %v508_v45  ;;  %v510_v52 = vpop.f32.mrf.mxu0 }
  0xea   :  { %v511_v53 = vadd.f32 %v510_v52, %v509_v48  ;;  %v538_v54 = vpop.f32.mrf.mxu1 }
  0xeb   :  { %v436_v55 = vadd.f32 %v489_v49, %v404_v51  ;;  %v539_v56 = vadd.f32 %v538_v54, %v537_v50  ;;  %v512_v57 = vpop.f32.mrf.mxu0 }
  0xec   :  { %v540_v58 = vpop.f32.mrf.mxu1 }
  0xed   :  { %v439_v59 = vmax.f32 %v436_v55, 0.0  ;;  %v407_v60 = vadd.f32 %v539_v56, %v511_v53  ;;  %v513_v61 = vpop.f32.mrf.mxu0 }
  0xee   :  { %v514_v62 = vadd.f32 %v513_v61, %v512_v57  ;;  %v541_v63 = vpop.f32.mrf.mxu1 }
  0xef   :  { %442 = vst [vmem:[%s737_s3] sm:$0xff] %v439_v59  ;;  %v437_v0 = vadd.f32 %v489_v49, %v407_v60  ;;  %v542_v1 = vadd.f32 %v541_v63, %v540_v58  ;;  %v515_v2 = vpop.f32.mrf.mxu0 }
  0xf0   :  { %v543_v3 = vpop.f32.mrf.mxu1 }
  0xf1   :  { %v440_v4 = vmax.f32 %v437_v0, 0.0  ;;  %v412_v5 = vadd.f32 %v542_v1, %v514_v62  ;;  %v516_v6 = vpop.f32.mrf.mxu0 }
  0xf2   :  { %v544_v7 = vpop.f32.mrf.mxu1 }
  0xf3   :  { %443 = vst [vmem:[%s737_s3 + $0x8] sm:$0xff] %v440_v4  ;;  %v438_v8 = vadd.f32 %v489_v49, %v412_v5 }
  0xf5   :  { %v441_v9 = vmax.f32 %v438_v8, 0.0 }
  0xf7   :  { %444 = vst [vmem:[%s737_s3 + $0x10] sm:$0xff] %v441_v9 }

// kernel: deep_q_network_forward.7
= control target key start
LH: loop header
LB: loop body
LE: loop exit
PB: predicated region body
PF: predicated region fallthrough
CT: control target
= control target key end

     0   :  { %s941_s12 = smov 0   ;;  %s943_s13 = smov 0   ;;  %s1024_s0 = inlined_call_operand.vmem [shape: bf16[8,1024], index: 0, kind: input, shape index: {}]   ;;  %s1025_s1 = inlined_call_operand.vmem [shape: bf16[1024,128], index: 1, kind: input, shape index: {}]   ;;  %s1026_s2 = inlined_call_operand.vmem [shape: f32[1,128], index: 2, kind: input, shape index: {}]   ;;  %s1027_s3 = inlined_call_operand.vmem [shape: f32[8,128], index: 3, kind: output, shape index: {}]  }
   0x1   :  { %s945_s14 = smov 0  }
   0x2 LB: > { %s25_s15 = sadd.s32 1, %s914_s13  ;;  %p744_p0 = scmp.ge.s32.totalorder %s918_s14, 1  ;;  %s918_s14 = sphi %s945_s14, %s13_s14   ;;  %s914_s13 = sphi %s943_s13, %s1029_s13   ;;  %s910_s12 = sphi %s941_s12, %s1028_s12  }
   0x3   : > { %p26_p1 = scmp.ge.s32.totalorder %s25_s15, 2  ;;  %p189_p2 = scmp.lt.s32.totalorder %s918_s14, 3 }
   0x5   : > { %s1031_s15 = smov (%p26_p1, %s25_s15), 0  ;;  %p190_p3 = pnand %p744_p0, %p189_p2 }
   0x6   : > { %s745_s16 = sshll.u32 (!%p190_p3), %s910_s12, 2  ;;  %s747_s17 = sshll.u32 (!%p190_p3), %s910_s12, 6 }
   0x7   : > { %193 = sbr.rel (%p190_p3) target bundleno = 271 (0x10f), region = 32  ;;  %p233_p4 = scmp.lt.s32.totalorder (!%p190_p3), %s745_s16, 7 }
   0x8   : > { %p241_p5 = scmp.lt.s32.totalorder (!%p190_p3), %s747_s17, 127  ;;  %p749_p6 = scmp.ne.s32.totalorder (!%p190_p3), %s910_s12, 0 }
   0xc   : > { %s1033_s16 = smov (!%p233_p4, %s745_s16), 7  ;;  %s1035_s17 = smov (!%p241_p5, %s747_s17), 127 }
   0xd   : > { %s746_s18 = sshll.u32 %s1033_s16, 2  ;;  %s748_s22 = sshll.u32 %s1035_s17, 2 }
   0xe   : > { %s966_s21 = scalar_lea.vmem %s1024_s0, %s746_s18  ;;  %s971_s25 = scalar_lea.vmem %s1025_s1, %s748_s22 }
   0xf   : > { %263 = sbr.rel (%p749_p6) target bundleno = 22 (0x16), region = 36 }
  0x14   : > { %v920_v0 = vmov 0.0  }
  0x15   : > { %264 = vst [vmem:[#allocation2] sm:$0xff] %v920_v0 }
  0x16 PF: > { %v860_v1 = vld [vmem:[%s971_s25 + $0x78] sm:$0xff]   ;;  %v864_v5 = vld [vmem:[%s971_s25 + $0x70] sm:$0xff]   ;;  %v868_v9 = vld [vmem:[%s971_s25 + $0x68] sm:$0xff]   ;;  %p786_p7 = scmp.ne.s32.totalorder %s910_s12, 1 }
  0x17   : > { %v861_v2 = vld [vmem:[%s971_s25 + $0xf8] sm:$0xff]   ;;  %791 = vmatprep.subr.bf16.mxu0 %v860_v1  ;;  %v865_v6 = vld [vmem:[%s971_s25 + $0xf0] sm:$0xff]   ;;  %v869_v10 = vld [vmem:[%s971_s25 + $0xe8] sm:$0xff]  }
  0x18   : > { %v862_v3 = vld [vmem:[%s971_s25 + $0x38] sm:$0xff]   ;;  %813 = vmatprep.subr.bf16.mxu1 %v861_v2  ;;  %v866_v7 = vld [vmem:[%s971_s25 + $0x30] sm:$0xff]   ;;  %v870_v11 = vld [vmem:[%s971_s25 + $0x28] sm:$0xff]  }
  0x19   : > { %v863_v4 = vld [vmem:[%s971_s25 + $0xb8] sm:$0xff]   ;;  %792 = vmatpush3.bf16.msra.mxu0 %v862_v3  ;;  %v867_v8 = vld [vmem:[%s971_s25 + $0xb0] sm:$0xff]   ;;  %v871_v12 = vld [vmem:[%s971_s25 + $0xa8] sm:$0xff]  }
  0x1a   : > { %814 = vmatpush3.bf16.msra.mxu1 %v863_v4  ;;  %793 = vmatprep.subr.bf16.mxu0 %v864_v5  ;;  %v872_v13 = vld [vmem:[%s971_s25 + $0x60] sm:$0xff]   ;;  %v876_v17 = vld [vmem:[%s971_s25 + $0x58] sm:$0xff]   ;;  %v880_v21 = vld [vmem:[%s971_s25 + $0x50] sm:$0xff]  }
  0x1b   : > { %815 = vmatprep.subr.bf16.mxu1 %v865_v6  ;;  %v873_v14 = vld [vmem:[%s971_s25 + $0xe0] sm:$0xff]   ;;  %v877_v18 = vld [vmem:[%s971_s25 + $0xd8] sm:$0xff]   ;;  %v881_v22 = vld [vmem:[%s971_s25 + $0xd0] sm:$0xff]  }
  0x1c   : > { %v874_v15 = vld [vmem:[%s971_s25 + $0x20] sm:$0xff]   ;;  %v878_v19 = vld [vmem:[%s971_s25 + $0x18] sm:$0xff]   ;;  %v882_v23 = vld [vmem:[%s971_s25 + $0x10] sm:$0xff]  }
  0x1d   : > { %794 = vmatpush3.bf16.msra.mxu0 %v866_v7  ;;  %v875_v16 = vld [vmem:[%s971_s25 + $0xa0] sm:$0xff]   ;;  %v879_v20 = vld [vmem:[%s971_s25 + $0x98] sm:$0xff]   ;;  %v883_v24 = vld [vmem:[%s971_s25 + $0x90] sm:$0xff]  }
  0x1e   : > { %816 = vmatpush3.bf16.msra.mxu1 %v867_v8  ;;  %795 = vmatprep.subr.bf16.mxu0 %v868_v9  ;;  %v884_v25 = vld [vmem:[%s971_s25 + $0x48] sm:$0xff]   ;;  %v888_v29 = vld [vmem:[%s971_s25 + $0x40] sm:$0xff]  }
  0x1f   : > { %817 = vmatprep.subr.bf16.mxu1 %v869_v10  ;;  %v885_v26 = vld [vmem:[%s971_s25 + $0xc8] sm:$0xff]   ;;  %v889_v30 = vld [vmem:[%s971_s25 + $0xc0] sm:$0xff]  }
  0x20   : > { %v886_v27 = vld [vmem:[%s971_s25 + $0x8] sm:$0xff]   ;;  %v890_v31 = vld [vmem:[%s971_s25] sm:$0xff]  }
  0x21   : > { %796 = vmatpush3.bf16.msra.mxu0 %v870_v11  ;;  %v887_v28 = vld [vmem:[%s971_s25 + $0x88] sm:$0xff]   ;;  %v891_v32 = vld [vmem:[%s971_s25 + $0x80] sm:$0xff]  }
  0x22   : > { %818 = vmatpush3.bf16.msra.mxu1 %v871_v12  ;;  %797 = vmatprep.subr.bf16.mxu0 %v872_v13  ;;  %v266_v33 = vld [vmem:[%s966_s21] sm:$0xff]  ;;  %v267_v34 = vld [vmem:[%s966_s21 + $0x8] sm:$0xff] }
  0x23   : > { %819 = vmatprep.subr.bf16.mxu1 %v873_v14  ;;  %v750_v35 = vcombine.low %v266_v33, %v266_v33  ;;  %v751_v36 = vcombine.high %v266_v33, %v266_v33  ;;  %v752_v37 = vcombine.low %v267_v34, %v267_v34  ;;  %v753_v38 = vcombine.high %v267_v34, %v267_v34  ;;  %v265_v45 = vld [vmem:[#allocation2] sm:$0xff] }
  0x25   : > { %798 = vmatpush3.bf16.msra.mxu0 %v874_v15  ;;  %570 = vmatprep.mubr.bf16.mxu0 %v751_v36 }
  0x26   : > { %820 = vmatpush3.bf16.msra.mxu1 %v875_v16  ;;  %799 = vmatprep.subr.bf16.mxu0 %v876_v17 }
  0x27   : > { %821 = vmatprep.subr.bf16.mxu1 %v877_v18  ;;  %610 = vmatprep.mubr.bf16.mxu1 %v753_v38 }
  0x29   : > { %800 = vmatpush3.bf16.msra.mxu0 %v878_v19 }
  0x2a   : > { %822 = vmatpush3.bf16.msra.mxu1 %v879_v20  ;;  %801 = vmatprep.subr.bf16.mxu0 %v880_v21 }
  0x2b   : > { %823 = vmatprep.subr.bf16.mxu1 %v881_v22 }
  0x2d   : > { %802 = vmatpush3.bf16.msra.mxu0 %v882_v23 }
  0x2e   : > { %824 = vmatpush3.bf16.msra.mxu1 %v883_v24  ;;  %803 = vmatprep.subr.bf16.mxu0 %v884_v25 }
  0x2f   : > { %825 = vmatprep.subr.bf16.mxu1 %v885_v26 }
  0x31   : > { %804 = vmatpush3.bf16.msra.mxu0 %v886_v27 }
  0x32   : > { %826 = vmatpush3.bf16.msra.mxu1 %v887_v28  ;;  %805 = vmatprep.subr.bf16.mxu0 %v888_v29 }
  0x33   : > { %827 = vmatprep.subr.bf16.mxu1 %v889_v30 }
  0x35   : > { %806 = vmatpush3.bf16.msra.mxu0 %v890_v31 }
  0x36   : > { %828 = vmatpush3.bf16.msra.mxu1 %v891_v32 }
  0x38   : > { %571 = vmatmul.mubr.bf16.vlgmr.msra.gmra.mxu0 %v750_v35 }
  0x39   : > { %611 = vmatmul.mubr.bf16.vlgmr.msra.gmra.mxu1 %v752_v37 }
  0xf8   : > { %v807_v39 = vpop.f32.mrf.mxu0 }
  0xf9   : > { %v829_v40 = vpop.f32.mrf.mxu1 }
  0xfa   : > { %v808_v41 = vpop.f32.mrf.mxu0 }
  0xfb   : > { %v830_v42 = vpop.f32.mrf.mxu1  ;;  %v809_v43 = vadd.f32 %v808_v41, %v807_v39 }
  0xfc   : > { %v831_v44 = vadd.f32 %v830_v42, %v829_v40  ;;  %v810_v46 = vpop.f32.mrf.mxu0 }
  0xfd   : > { %v832_v47 = vpop.f32.mrf.mxu1 }
  0xfe   : > { %v613_v48 = vadd.f32 %v831_v44, %v809_v43  ;;  %v811_v49 = vpop.f32.mrf.mxu0  ;;  %623 = sbr.rel (%p786_p7) target bundleno = 271 (0x10f), region = 40 }
  0xff   : > { %v833_v50 = vpop.f32.mrf.mxu1 }
 0x100   : > { %v618_v51 = vadd.f32 %v613_v48, %v265_v45 }
 0x102   : > { %619 = vst [vmem:[#allocation2] sm:$0xff] %v618_v51 }
 0x103   : > { %v787_v53 = vld [vmem:[%s1026_s2] ss:$0 sm:$0xff] }
 0x109   : > { %v624_v52 = vld [vmem:[#allocation2] sm:$0xff] }
 0x10a   : > { %v632_v54 = vadd.f32 %v787_v53, %v624_v52 }
 0x10c   : > { %v633_v55 = vmax.f32 %v632_v54, 0.0 }
 0x10e   : > { %634 = vst [vmem:[%s1027_s3] sm:$0xff] %v633_v55 }
 0x10f PF: > { %s13_s14 = sadd.s32 1, %s918_s14   ;;  %s1028_s12 = smov %s914_s13 }
 0x110   : > { %p10_p8 = scmp.ge.s32.totalorder %s13_s14, 4   ;;  %s1029_s13 = smov %s1031_s15 }
 0x112   :  { %12 = sbr.rel (!%p10_p8) target bundleno = 2 (0x2), region = 76 }

// kernel: deep_q_network_forward.8
= control target key start
LH: loop header
LB: loop body
LE: loop exit
PB: predicated region body
PF: predicated region fallthrough
CT: control target
= control target key end

     0   :  { %v436_v1 = vmov 0   ;;  %v319_v34 = vlaneseq  ;;  %s571_s1 = inlined_call_operand.vmem [shape: bf16[128,512], index: 1, kind: input, shape index: {}]   ;;  %s572_s0 = inlined_call_operand.vmem [shape: bf16[8,128], index: 0, kind: input, shape index: {}]   ;;  %s573_s2 = inlined_call_operand.vmem [shape: f32[1,512], index: 2, kind: input, shape index: {}]   ;;  %s574_s3 = inlined_call_operand.vmem [shape: f32[8,512], index: 3, kind: output, shape index: {}]  }
   0x1   :  { %v388_v0 = vld [vmem:[%s571_s1 + $0xe4] ss:$16 sps:$4 sm:$0xff]   ;;  %252 = vmatprep.mubr.bf16.mxu0 %v436_v1  ;;  %293 = vmatprep.mubr.bf16.mxu1 %v436_v1  ;;  %v390_v2 = vld [vmem:[%s571_s1 + $0xec] ss:$16 sps:$4 sm:$0xff]   ;;  %v392_v3 = vld [vmem:[%s571_s1 + $0xe0] ss:$16 sps:$4 sm:$0xff]  }
   0x2   :  { %220 = vmatprep.subr.bf16.mxu0 %v388_v0  ;;  %v393_v4 = vld [vmem:[%s571_s1 + $0xe8] ss:$16 sps:$4 sm:$0xff]   ;;  %261 = vmatprep.subr.bf16.mxu1 %v390_v2  ;;  %v394_v5 = vld [vmem:[%s571_s1 + $0xc4] ss:$16 sps:$4 sm:$0xff]   ;;  %v396_v6 = vld [vmem:[%s571_s1 + $0xcc] ss:$16 sps:$4 sm:$0xff]  }
   0x3   :  { %221 = vmatpush1.bf16.msra.mxu0 %v392_v3  ;;  %262 = vmatpush1.bf16.msra.mxu1 %v393_v4  ;;  %v398_v7 = vld [vmem:[%s571_s1 + $0xc0] ss:$16 sps:$4 sm:$0xff]   ;;  %v399_v8 = vld [vmem:[%s571_s1 + $0xc8] ss:$16 sps:$4 sm:$0xff]   ;;  %v400_v9 = vld [vmem:[%s571_s1 + $0xa4] ss:$16 sps:$4 sm:$0xff]  }
   0x4   :  { %222 = vmatprep.subr.bf16.mxu0 %v394_v5  ;;  %263 = vmatprep.subr.bf16.mxu1 %v396_v6  ;;  %v402_v10 = vld [vmem:[%s571_s1 + $0xac] ss:$16 sps:$4 sm:$0xff]   ;;  %v404_v11 = vld [vmem:[%s571_s1 + $0xa0] ss:$16 sps:$4 sm:$0xff]   ;;  %v405_v12 = vld [vmem:[%s571_s1 + $0xa8] ss:$16 sps:$4 sm:$0xff]  }
   0x5   :  { %v406_v13 = vld [vmem:[%s571_s1 + $0x84] ss:$16 sps:$4 sm:$0xff]   ;;  %v408_v14 = vld [vmem:[%s571_s1 + $0x8c] ss:$16 sps:$4 sm:$0xff]   ;;  %v410_v15 = vld [vmem:[%s571_s1 + $0x80] ss:$16 sps:$4 sm:$0xff]  }
   0x6   :  { %v411_v16 = vld [vmem:[%s571_s1 + $0x88] ss:$16 sps:$4 sm:$0xff]   ;;  %v412_v17 = vld [vmem:[%s571_s1 + $0x64] ss:$16 sps:$4 sm:$0xff]   ;;  %v414_v18 = vld [vmem:[%s571_s1 + $0x6c] ss:$16 sps:$4 sm:$0xff]  }
   0x7   :  { %223 = vmatpush1.bf16.msra.mxu0 %v398_v7  ;;  %264 = vmatpush1.bf16.msra.mxu1 %v399_v8  ;;  %v416_v19 = vld [vmem:[%s571_s1 + $0x60] ss:$16 sps:$4 sm:$0xff]   ;;  %v417_v20 = vld [vmem:[%s571_s1 + $0x68] ss:$16 sps:$4 sm:$0xff]   ;;  %v418_v21 = vld [vmem:[%s571_s1 + $0x44] ss:$16 sps:$4 sm:$0xff]  }
   0x8   :  { %224 = vmatprep.subr.bf16.mxu0 %v400_v9  ;;  %265 = vmatprep.subr.bf16.mxu1 %v402_v10  ;;  %v420_v22 = vld [vmem:[%s571_s1 + $0x4c] ss:$16 sps:$4 sm:$0xff]   ;;  %v422_v23 = vld [vmem:[%s571_s1 + $0x40] ss:$16 sps:$4 sm:$0xff]   ;;  %v423_v24 = vld [vmem:[%s571_s1 + $0x48] ss:$16 sps:$4 sm:$0xff]  }
   0x9   :  { %v424_v25 = vld [vmem:[%s571_s1 + $0x24] ss:$16 sps:$4 sm:$0xff]   ;;  %v426_v26 = vld [vmem:[%s571_s1 + $0x2c] ss:$16 sps:$4 sm:$0xff]   ;;  %v428_v27 = vld [vmem:[%s571_s1 + $0x20] ss:$16 sps:$4 sm:$0xff]  }
   0xa   :  { %v429_v28 = vld [vmem:[%s571_s1 + $0x28] ss:$16 sps:$4 sm:$0xff]   ;;  %v430_v29 = vld [vmem:[%s571_s1 + $0x4] ss:$16 sps:$4 sm:$0xff]   ;;  %v432_v30 = vld [vmem:[%s571_s1 + $0xc] ss:$16 sps:$4 sm:$0xff]  }
   0xb   :  { %225 = vmatpush1.bf16.msra.mxu0 %v404_v11  ;;  %266 = vmatpush1.bf16.msra.mxu1 %v405_v12  ;;  %v434_v31 = vld [vmem:[%s571_s1] ss:$16 sps:$4 sm:$0xff]   ;;  %v435_v32 = vld [vmem:[%s571_s1 + $0x8] ss:$16 sps:$4 sm:$0xff]   ;;  %v320_v35 = vshrl.u32 %v319_v34, 7 }
   0xc   :  { %226 = vmatprep.subr.bf16.mxu0 %v406_v13  ;;  %267 = vmatprep.subr.bf16.mxu1 %v408_v14  ;;  %v27_v33 = vld [vmem:[%s572_s0] sm:$0xf] }
   0xd   :  { %v321_v36 = vsub.s32 0, %v320_v35  ;;  %v329_v37 = vsub.s32 2, %v320_v35  ;;  %v317_v38 = vld [vmem:[%s573_s2] sm:$0xf]  ;;  %v325_v39 = vsub.s32 1, %v320_v35  ;;  %v333_v40 = vsub.s32 3, %v320_v35 }
   0xf   :  { %227 = vmatpush1.bf16.msra.mxu0 %v410_v15  ;;  %268 = vmatpush1.bf16.msra.mxu1 %v411_v16  ;;  %v322_v41 = vrot.slane %v317_v38, %v321_v36  ;;  %v330_v42 = vrot.slane %v317_v38, %v329_v37  ;;  %v326_v43 = vrot.slane %v317_v38, %v325_v39 }
  0x10   :  { %228 = vmatprep.subr.bf16.mxu0 %v412_v17  ;;  %269 = vmatprep.subr.bf16.mxu1 %v414_v18  ;;  %v334_v44 = vrot.slane %v317_v38, %v333_v40 }
  0x13   :  { %229 = vmatpush1.bf16.msra.mxu0 %v416_v19  ;;  %270 = vmatpush1.bf16.msra.mxu1 %v417_v20 }
  0x14   :  { %230 = vmatprep.subr.bf16.mxu0 %v418_v21  ;;  %271 = vmatprep.subr.bf16.mxu1 %v420_v22 }
  0x17   :  { %231 = vmatpush1.bf16.msra.mxu0 %v422_v23  ;;  %272 = vmatpush1.bf16.msra.mxu1 %v423_v24 }
  0x18   :  { %232 = vmatprep.subr.bf16.mxu0 %v424_v25  ;;  %273 = vmatprep.subr.bf16.mxu1 %v426_v26 }
  0x1b   :  { %233 = vmatpush1.bf16.msra.mxu0 %v428_v27  ;;  %274 = vmatpush1.bf16.msra.mxu1 %v429_v28 }
  0x1c   :  { %234 = vmatprep.subr.bf16.mxu0 %v430_v29  ;;  %275 = vmatprep.subr.bf16.mxu1 %v432_v30 }
  0x1f   :  { %235 = vmatpush1.bf16.msra.mxu0 %v434_v31  ;;  %276 = vmatpush1.bf16.msra.mxu1 %v435_v32 }
  0x22   :  { %253 = vmatmul.mubr.bf16.vlgmr.msra.gmra.mxu0 %v27_v33  ;;  %294 = vmatmul.mubr.bf16.vlgmr.msra.gmra.mxu1 %v27_v33 }
  0xe2   :  { %v254_v45 = vpop.f32.mrf.mxu0  ;;  %v295_v46 = vpop.f32.mrf.mxu1 }
  0xe3   :  { %v339_v47 = vadd.f32 %v322_v41, %v254_v45  ;;  %v341_v48 = vadd.f32 %v330_v42, %v295_v46 }
  0xe4   :  { %v256_v49 = vpop.f32.mrf.mxu0  ;;  %v297_v50 = vpop.f32.mrf.mxu1 }
  0xe5   :  { %v343_v51 = vmax.f32 %v339_v47, 0.0  ;;  %v345_v52 = vmax.f32 %v341_v48, 0.0  ;;  %v340_v53 = vadd.f32 %v326_v43, %v256_v49  ;;  %v342_v54 = vadd.f32 %v334_v44, %v297_v50 }
  0xe6   :  { %v258_v55 = vpop.f32.mrf.mxu0  ;;  %v299_v56 = vpop.f32.mrf.mxu1 }
  0xe7   :  { %347 = vst [vmem:[%s574_s3] sm:$0xff] %v343_v51  ;;  %349 = vst [vmem:[%s574_s3 + $0x10] sm:$0xff] %v345_v52  ;;  %v344_v57 = vmax.f32 %v340_v53, 0.0  ;;  %v346_v58 = vmax.f32 %v342_v54, 0.0 }
  0xe8   :  { %v259_v59 = vpop.f32.mrf.mxu0  ;;  %v300_v60 = vpop.f32.mrf.mxu1 }
  0xe9   :  { %348 = vst [vmem:[%s574_s3 + $0x8] sm:$0xff] %v344_v57  ;;  %350 = vst [vmem:[%s574_s3 + $0x18] sm:$0xff] %v346_v58 }

// kernel: deep_q_network_forward.9
= control target key start
LH: loop header
LB: loop body
LE: loop exit
PB: predicated region body
PF: predicated region fallthrough
CT: control target
= control target key end

     0   :  { %s637_s1 = inlined_call_operand.vmem [shape: bf16[512,128], index: 1, kind: input, shape index: {}]   ;;  %s638_s0 = inlined_call_operand.vmem [shape: bf16[8,512], index: 0, kind: input, shape index: {}]   ;;  %s639_s2 = inlined_call_operand.vmem [shape: f32[1,128], index: 2, kind: input, shape index: {}]   ;;  %s640_s3 = inlined_call_operand.vmem [shape: f32[8,128], index: 3, kind: output, shape index: {}]  }
   0x1   :  { %v473_v0 = vld [vmem:[%s637_s1 + $0x78] sm:$0xff]   ;;  %v477_v4 = vld [vmem:[%s637_s1 + $0x70] sm:$0xff]   ;;  %v481_v8 = vld [vmem:[%s637_s1 + $0x68] sm:$0xff]  }
   0x2   :  { %v474_v1 = vld [vmem:[%s637_s1 + $0xf8] sm:$0xff]   ;;  %429 = vmatprep.subr.bf16.mxu0 %v473_v0  ;;  %v478_v5 = vld [vmem:[%s637_s1 + $0xf0] sm:$0xff]   ;;  %v482_v9 = vld [vmem:[%s637_s1 + $0xe8] sm:$0xff]  }
   0x3   :  { %v475_v2 = vld [vmem:[%s637_s1 + $0x38] sm:$0xff]   ;;  %451 = vmatprep.subr.bf16.mxu1 %v474_v1  ;;  %v479_v6 = vld [vmem:[%s637_s1 + $0x30] sm:$0xff]   ;;  %v483_v10 = vld [vmem:[%s637_s1 + $0x28] sm:$0xff]  }
   0x4   :  { %v476_v3 = vld [vmem:[%s637_s1 + $0xb8] sm:$0xff]   ;;  %430 = vmatpush3.bf16.msra.mxu0 %v475_v2  ;;  %v480_v7 = vld [vmem:[%s637_s1 + $0xb0] sm:$0xff]   ;;  %v484_v11 = vld [vmem:[%s637_s1 + $0xa8] sm:$0xff]  }
   0x5   :  { %452 = vmatpush3.bf16.msra.mxu1 %v476_v3  ;;  %431 = vmatprep.subr.bf16.mxu0 %v477_v4  ;;  %v485_v12 = vld [vmem:[%s637_s1 + $0x60] sm:$0xff]   ;;  %v489_v16 = vld [vmem:[%s637_s1 + $0x58] sm:$0xff]   ;;  %v493_v20 = vld [vmem:[%s637_s1 + $0x50] sm:$0xff]  }
   0x6   :  { %453 = vmatprep.subr.bf16.mxu1 %v478_v5  ;;  %v486_v13 = vld [vmem:[%s637_s1 + $0xe0] sm:$0xff]   ;;  %v490_v17 = vld [vmem:[%s637_s1 + $0xd8] sm:$0xff]   ;;  %v494_v21 = vld [vmem:[%s637_s1 + $0xd0] sm:$0xff]  }
   0x7   :  { %v487_v14 = vld [vmem:[%s637_s1 + $0x20] sm:$0xff]   ;;  %v491_v18 = vld [vmem:[%s637_s1 + $0x18] sm:$0xff]   ;;  %v495_v22 = vld [vmem:[%s637_s1 + $0x10] sm:$0xff]  }
   0x8   :  { %432 = vmatpush3.bf16.msra.mxu0 %v479_v6  ;;  %v488_v15 = vld [vmem:[%s637_s1 + $0xa0] sm:$0xff]   ;;  %v492_v19 = vld [vmem:[%s637_s1 + $0x98] sm:$0xff]   ;;  %v496_v23 = vld [vmem:[%s637_s1 + $0x90] sm:$0xff]  }
   0x9   :  { %454 = vmatpush3.bf16.msra.mxu1 %v480_v7  ;;  %433 = vmatprep.subr.bf16.mxu0 %v481_v8  ;;  %v497_v24 = vld [vmem:[%s637_s1 + $0x48] sm:$0xff]   ;;  %v501_v28 = vld [vmem:[%s637_s1 + $0x40] sm:$0xff]  }
   0xa   :  { %455 = vmatprep.subr.bf16.mxu1 %v482_v9  ;;  %v498_v25 = vld [vmem:[%s637_s1 + $0xc8] sm:$0xff]   ;;  %v502_v29 = vld [vmem:[%s637_s1 + $0xc0] sm:$0xff]  }
   0xb   :  { %v499_v26 = vld [vmem:[%s637_s1 + $0x8] sm:$0xff]   ;;  %v503_v30 = vld [vmem:[%s637_s1] sm:$0xff]  }
   0xc   :  { %434 = vmatpush3.bf16.msra.mxu0 %v483_v10  ;;  %v500_v27 = vld [vmem:[%s637_s1 + $0x88] sm:$0xff]   ;;  %v504_v31 = vld [vmem:[%s637_s1 + $0x80] sm:$0xff]  }
   0xd   :  { %456 = vmatpush3.bf16.msra.mxu1 %v484_v11  ;;  %435 = vmatprep.subr.bf16.mxu0 %v485_v12  ;;  %v21_v32 = vld [vmem:[%s638_s0] sm:$0xff]  ;;  %v22_v33 = vld [vmem:[%s638_s0 + $0x8] sm:$0xff] }
   0xe   :  { %457 = vmatprep.subr.bf16.mxu1 %v486_v13  ;;  %v392_v34 = vcombine.low %v21_v32, %v21_v32  ;;  %v393_v35 = vcombine.high %v21_v32, %v21_v32  ;;  %v394_v36 = vcombine.low %v22_v33, %v22_v33  ;;  %v395_v37 = vcombine.high %v22_v33, %v22_v33  ;;  %v428_v44 = vld [vmem:[%s639_s2] ss:$0 sm:$0xff] }
  0x10   :  { %436 = vmatpush3.bf16.msra.mxu0 %v487_v14  ;;  %325 = vmatprep.mubr.bf16.mxu0 %v393_v35 }
  0x11   :  { %458 = vmatpush3.bf16.msra.mxu1 %v488_v15  ;;  %437 = vmatprep.subr.bf16.mxu0 %v489_v16 }
  0x12   :  { %459 = vmatprep.subr.bf16.mxu1 %v490_v17  ;;  %365 = vmatprep.mubr.bf16.mxu1 %v395_v37 }
  0x14   :  { %438 = vmatpush3.bf16.msra.mxu0 %v491_v18 }
  0x15   :  { %460 = vmatpush3.bf16.msra.mxu1 %v492_v19  ;;  %439 = vmatprep.subr.bf16.mxu0 %v493_v20 }
  0x16   :  { %461 = vmatprep.subr.bf16.mxu1 %v494_v21 }
  0x18   :  { %440 = vmatpush3.bf16.msra.mxu0 %v495_v22 }
  0x19   :  { %462 = vmatpush3.bf16.msra.mxu1 %v496_v23  ;;  %441 = vmatprep.subr.bf16.mxu0 %v497_v24 }
  0x1a   :  { %463 = vmatprep.subr.bf16.mxu1 %v498_v25 }
  0x1c   :  { %442 = vmatpush3.bf16.msra.mxu0 %v499_v26 }
  0x1d   :  { %464 = vmatpush3.bf16.msra.mxu1 %v500_v27  ;;  %443 = vmatprep.subr.bf16.mxu0 %v501_v28 }
  0x1e   :  { %465 = vmatprep.subr.bf16.mxu1 %v502_v29 }
  0x20   :  { %444 = vmatpush3.bf16.msra.mxu0 %v503_v30 }
  0x21   :  { %466 = vmatpush3.bf16.msra.mxu1 %v504_v31 }
  0x23   :  { %326 = vmatmul.mubr.bf16.vlgmr.msra.gmra.mxu0 %v392_v34 }
  0x24   :  { %366 = vmatmul.mubr.bf16.vlgmr.msra.gmra.mxu1 %v394_v36 }
  0xe3   :  { %v445_v38 = vpop.f32.mrf.mxu0 }
  0xe4   :  { %v467_v39 = vpop.f32.mrf.mxu1 }
  0xe5   :  { %v446_v40 = vpop.f32.mrf.mxu0 }
  0xe6   :  { %v468_v41 = vpop.f32.mrf.mxu1  ;;  %v447_v42 = vadd.f32 %v446_v40, %v445_v38 }
  0xe7   :  { %v469_v43 = vadd.f32 %v468_v41, %v467_v39  ;;  %v448_v45 = vpop.f32.mrf.mxu0 }
  0xe8   :  { %v470_v46 = vpop.f32.mrf.mxu1 }
  0xe9   :  { %v368_v47 = vadd.f32 %v469_v43, %v447_v42  ;;  %v449_v48 = vpop.f32.mrf.mxu0 }
  0xea   :  { %v471_v49 = vpop.f32.mrf.mxu1 }
  0xeb   :  { %v386_v50 = vadd.f32 %v428_v44, %v368_v47 }
  0xed   :  { %387 = vst [vmem:[%s640_s3] sm:$0xff] %v386_v50 }

</bundles_post_ra>
